<compile_context>
chip_gen: v7x
topology: tpu7x:2x2x1
jax: 0.10.0
libtpu: 0.0.40
codegen_flags: <defaults>
</compile_context>

<pallas_src>
import numpy as np
import jax
import jax.numpy as jnp
from jax.experimental import pallas as pl
from jax.experimental.pallas import tpu as pltpu


# ----------------------------------------------------------------------------
# Host-side helpers (numpy / plain JAX)
# ----------------------------------------------------------------------------

def interp_matrix_align_corners(out_size, in_size):
    """1-D bilinear interpolation matrix, align_corners=True (matches PyTorch)."""
    A = np.zeros((out_size, in_size), np.float32)
    if in_size == 1 or out_size == 1:
        A[:, 0] = 1.0
        return A
    scale = (in_size - 1) / (out_size - 1)
    for i in range(out_size):
        src = i * scale
        i0 = min(int(np.floor(src)), in_size - 1)
        i1 = min(i0 + 1, in_size - 1)
        frac = src - i0
        A[i, i0] += 1.0 - frac
        A[i, i1] += frac
    return A


def fold_bn(conv_bias, gamma, beta, mean, var, eps=1e-5):
    """Inference-mode BN folded into per-channel (C,1) scale / bias columns."""
    scale = gamma / jnp.sqrt(var + eps)
    bias = (conv_bias - mean) * scale + beta
    return (scale.reshape(-1, 1).astype(jnp.float32),
            bias.reshape(-1, 1).astype(jnp.float32))


# ----------------------------------------------------------------------------
# Fused Pallas kernel: upsample + pad + concat + (conv3x3+BN+ReLU) x 2
# ----------------------------------------------------------------------------

def make_up_kernel(row_taps, c1, wp):
    """row_taps: per padded output row, a tuple of (src_row, weight) bilinear
    taps (trace-time constants); empty tuple -> all-zero (halo / F.pad) row."""
    hp = len(row_taps)
    n = hp * wp
    taps9 = [(ky, kx) for ky in range(3) for kx in range(3)]

    def shift(x, d):
        # shifted[:, p] = x[:, (p + d) mod n]  -- for interior p the mod never
        # wraps, so this realises the 3x3 tap offsets on the flat-padded layout.
        s = d % n
        if s == 0:
            return x
        return jnp.concatenate([x[:, s:], x[:, :s]], axis=1)

    def kernel(x1_ref, x2f_ref, awpT_ref, w1a_ref, w1b_ref, s1_ref, b1_ref,
               w2_ref, s2_ref, b2_ref, mask_ref, o_ref):
        cmid = w1a_ref.shape[1]
        cout = w2_ref.shape[1]

        # ---- fused bilinear 2x upsample of x1 (separable), emitted directly
        #      in the zero-padded, flattened (C1, Hp*Wp) layout ---------------
        #   W pass: one bf16 matmul with the halo-padded column-interp matrix.
        #   H pass: per padded row a <=2-term weighted sum with constant
        #           bilinear weights, then one lane-axis concat.
        xw = jnp.dot(x1_ref[0], awpT_ref[...],
                     preferred_element_type=jnp.float32)      # (H1*C1, Wp) f32
        zero_row = jnp.zeros((c1, wp), jnp.bfloat16)
        rows = []
        for taps in row_taps:
            if not taps:
                rows.append(zero_row)
            else:
                r = None
                for (hsrc, wgt) in taps:
                    blk = xw[hsrc * c1:(hsrc + 1) * c1, :] * wgt
                    r = blk if r is None else r + blk
                rows.append(r.astype(jnp.bfloat16))
        xf1 = jnp.concatenate(rows, axis=1)                   # (C1, N) bf16
        xf2 = x2f_ref[0]                                      # (C2, N) bf16

        # ---- conv1: 3x3 / pad=1, K-split over {x2, x1_up}, tap-accumulated --
        acc1 = jnp.zeros((cmid, n), jnp.float32)
        for t, (ky, kx) in enumerate(taps9):
            d = (ky - 1) * wp + (kx - 1)
            acc1 = acc1 + jnp.dot(w1a_ref[t], shift(xf2, d),
                                  preferred_element_type=jnp.float32)
            acc1 = acc1 + jnp.dot(w1b_ref[t], shift(xf1, d),
                                  preferred_element_type=jnp.float32)
        h1 = jnp.maximum(acc1 * s1_ref[...] + b1_ref[...], 0.0)   # folded BN+ReLU
        h1 = (h1 * mask_ref[...]).astype(jnp.bfloat16)            # re-zero halo

        # ---- conv2 on the VMEM-resident intermediate ------------------------
        acc2 = jnp.zeros((cout, n), jnp.float32)
        for t, (ky, kx) in enumerate(taps9):
            d = (ky - 1) * wp + (kx - 1)
            acc2 = acc2 + jnp.dot(w2_ref[t], shift(h1, d),
                                  preferred_element_type=jnp.float32)
        y = jnp.maximum(acc2 * s2_ref[...] + b2_ref[...], 0.0)
        # lane-dense store: (Cout, Hp*Wp), 324 lanes instead of Cout=4 lanes
        o_ref[0] = (y * mask_ref[...]).astype(o_ref.dtype)

    return kernel


# ----------------------------------------------------------------------------
# Forward pass of Up(in_channels, out_channels, bilinear=True)
# ----------------------------------------------------------------------------

def up_forward(x1_nchw, x2_nchw, params, bn_eps=1e-5):
    B, C1, H1, W1 = x1_nchw.shape
    _, C2, H, W = x2_nchw.shape
    Hp, Wp = H + 2, W + 2
    N = Hp * Wp
    Hu, Wu = 2 * H1, 2 * W1
    diffY, diffX = H - Hu, W - Wu
    Cmid = params["w1"].shape[0]
    Cout = params["w2"].shape[0]

    # 1-D bilinear (align_corners=True) interpolation matrices (host constants)
    ah = interp_matrix_align_corners(Hu, H1)
    aw = interp_matrix_align_corners(Wu, W1)

    # column interp matrix with the 3x3-conv halo and F.pad left/right split
    # baked in (zero columns), transposed so the kernel runs  x1 @ awp^T
    awp = np.zeros((Wp, W1), np.float32)
    awp[1 + diffX // 2: 1 + diffX // 2 + Wu, :] = aw
    awpT = jnp.asarray(awp.T, dtype=jnp.bfloat16)                   # (W1, Wp)

    # per padded output row: bilinear taps into the H1 source rows
    row_taps = []
    for yi in range(Hp):
        y = yi - 1 - diffY // 2
        taps = []
        if 0 <= yi - 1 < H and 0 <= y < Hu:
            for hsrc in range(H1):
                wgt = float(ah[y, hsrc])
                if wgt != 0.0:
                    taps.append((hsrc, wgt))
        row_taps.append(tuple(taps))
    row_taps = tuple(row_taps)

    # interior mask: 1 inside the HxW image, 0 on the 1-pixel halo
    m = np.zeros((Hp, Wp), np.float32)
    m[1:H + 1, 1:W + 1] = 1.0
    mask = jnp.asarray(m.reshape(1, N))

    # activations: bf16, channel-first.  x1 is regrouped (H1, C1) row-major so
    # the kernel never needs a tiled-dim reshape; x2 is halo-padded (small skip
    # tensor, one cheap XLA pad) and flattened on the lane axis.
    x1hc = jnp.transpose(x1_nchw.astype(jnp.bfloat16),
                         (0, 2, 1, 3)).reshape(B, H1 * C1, W1)
    x2f = jnp.pad(x2_nchw, ((0, 0), (0, 0), (1, 1), (1, 1))) \
             .reshape(B, C2, N).astype(jnp.bfloat16)

    # conv weights regrouped host-side: per-tap (ky,kx) matrices, K-split into
    # the x2 part (first C2 channels of torch.cat) and the x1_up part.
    w1 = params["w1"]                                   # (Cmid, C2+C1, 3, 3)
    w1a = jnp.transpose(w1[:, :C2], (2, 3, 0, 1)).reshape(9, Cmid, C2).astype(jnp.bfloat16)
    w1b = jnp.transpose(w1[:, C2:], (2, 3, 0, 1)).reshape(9, Cmid, C1).astype(jnp.bfloat16)
    w2t = jnp.transpose(params["w2"], (2, 3, 0, 1)).reshape(9, Cout, Cmid).astype(jnp.bfloat16)

    s1, b1 = fold_bn(params["b1"], params["g1"], params["be1"],
                     params["m1"], params["v1"], bn_eps)
    s2, b2 = fold_bn(params["b2"], params["g2"], params["be2"],
                     params["m2"], params["v2"], bn_eps)

    out_flat = pl.pallas_call(
        make_up_kernel(row_taps, C1, Wp),
        out_shape=jax.ShapeDtypeStruct((B, Cout, N), jnp.float32),
        grid=(B,),
        in_specs=[
            pl.BlockSpec((1, H1 * C1, W1), lambda b: (b, 0, 0)),   # x1 (regrouped)
            pl.BlockSpec((1, C2, N), lambda b: (b, 0, 0)),         # x2 (flat-padded)
            pl.BlockSpec((W1, Wp), lambda b: (0, 0)),              # awp^T
            pl.BlockSpec((9, Cmid, C2), lambda b: (0, 0, 0)),      # conv1 wt (x2 part)
            pl.BlockSpec((9, Cmid, C1), lambda b: (0, 0, 0)),      # conv1 wt (x1 part)
            pl.BlockSpec((Cmid, 1), lambda b: (0, 0)),             # BN1 scale
            pl.BlockSpec((Cmid, 1), lambda b: (0, 0)),             # BN1 bias
            pl.BlockSpec((9, Cout, Cmid), lambda b: (0, 0, 0)),    # conv2 wt
            pl.BlockSpec((Cout, 1), lambda b: (0, 0)),             # BN2 scale
            pl.BlockSpec((Cout, 1), lambda b: (0, 0)),             # BN2 bias
            pl.BlockSpec((1, N), lambda b: (0, 0)),                # interior mask
        ],
        out_specs=pl.BlockSpec((1, Cout, N), lambda b: (b, 0, 0)),
        compiler_params=pltpu.CompilerParams(
            dimension_semantics=("parallel",),
            vmem_limit_bytes=32 * 1024 * 1024),
    )(x1hc, x2f, awpT, w1a, w1b, s1, b1, w2t, s2, b2, mask)

    # drop the halo: (B, Cout, Hp*Wp) -> (B, Cout, H, W)   (tiny XLA slice)
    return out_flat.reshape(B, Cout, Hp, Wp)[:, :, 1:H + 1, 1:W + 1]


# ----------------------------------------------------------------------------
# Pure-JAX (f32) reference for correctness checking
# ----------------------------------------------------------------------------

def up_forward_ref(x1, x2, params, bn_eps=1e-5):
    B, C1, H1, W1 = x1.shape
    H, W = x2.shape[2], x2.shape[3]
    ah = jnp.asarray(interp_matrix_align_corners(2 * H1, H1))
    aw = jnp.asarray(interp_matrix_align_corners(2 * W1, W1))
    xh = jnp.einsum('ih,bchw->bciw', ah, x1)
    x1u = jnp.einsum('bciw,jw->bcij', xh, aw)
    diffY = H - x1u.shape[2]
    diffX = W - x1u.shape[3]
    x1u = jnp.pad(x1u, ((0, 0), (0, 0),
                        (diffY // 2, diffY - diffY // 2),
                        (diffX // 2, diffX - diffX // 2)))
    x = jnp.concatenate([x2, x1u], axis=1)

    def conv_bn_relu(x, w, b, g, be, m, v):
        y = jax.lax.conv_general_dilated(
            x, w, (1, 1), ((1, 1), (1, 1)),
            dimension_numbers=('NCHW', 'OIHW', 'NCHW'))
        y = y + b[None, :, None, None]
        y = (y - m[None, :, None, None]) * \
            (g / jnp.sqrt(v + bn_eps))[None, :, None, None] + be[None, :, None, None]
        return jnp.maximum(y, 0.0)

    h = conv_bn_relu(x, params["w1"], params["b1"], params["g1"],
                     params["be1"], params["m1"], params["v1"])
    return conv_bn_relu(h, params["w2"], params["b2"], params["g2"],
                        params["be2"], params["m2"], params["v2"])


# ----------------------------------------------------------------------------
# Parameters + driver
# ----------------------------------------------------------------------------

def make_up_params(in_channels, out_channels, key):
    """Deterministic parameters for DoubleConv(in, out, mid=in//2), BN eval mode."""
    mid = in_channels // 2
    ks = jax.random.split(key, 12)
    p = {}
    p["w1"] = jax.random.normal(ks[0], (mid, in_channels, 3, 3), jnp.float32) * 0.1
    p["b1"] = jax.random.normal(ks[1], (mid,), jnp.float32) * 0.1
    p["g1"] = 1.0 + 0.1 * jax.random.normal(ks[2], (mid,), jnp.float32)
    p["be1"] = 0.1 * jax.random.normal(ks[3], (mid,), jnp.float32)
    p["m1"] = 0.1 * jax.random.normal(ks[4], (mid,), jnp.float32)
    p["v1"] = 1.0 + 0.1 * jnp.abs(jax.random.normal(ks[5], (mid,), jnp.float32))
    p["w2"] = jax.random.normal(ks[6], (out_channels, mid, 3, 3), jnp.float32) * 0.1
    p["b2"] = jax.random.normal(ks[7], (out_channels,), jnp.float32) * 0.1
    p["g2"] = 1.0 + 0.1 * jax.random.normal(ks[8], (out_channels,), jnp.float32)
    p["be2"] = 0.1 * jax.random.normal(ks[9], (out_channels,), jnp.float32)
    p["m2"] = 0.1 * jax.random.normal(ks[10], (out_channels,), jnp.float32)
    p["v2"] = 1.0 + 0.1 * jnp.abs(jax.random.normal(ks[11], (out_channels,), jnp.float32))
    return p


if __name__ == "__main__":
    # Up(in_channels=8, out_channels=4, bilinear=True):
    #   x1: (B, in//2, H/2, W/2)  -- decoder feature
    #   x2: (B, in//2, H,   W)    -- skip connection
    in_channels, out_channels = 8, 4
    B, H, W = 2, 16, 16

    key = jax.random.PRNGKey(0)
    kx1, kx2, kp = jax.random.split(key, 3)
    x1 = jax.random.normal(kx1, (B, in_channels // 2, H // 2, W // 2), jnp.float32)
    x2 = jax.random.normal(kx2, (B, in_channels // 2, H, W), jnp.float32)
    params = make_up_params(in_channels, out_channels, kp)

    fwd = jax.jit(up_forward)
    out = jax.block_until_ready(fwd(x1, x2, params))

    assert out.shape == (B, out_channels, H, W), out.shape
    assert bool(jnp.all(jnp.isfinite(out)))

    # bf16 activations/weights in the kernel vs f32 reference -> loose tolerance
    ref = jax.block_until_ready(jax.jit(up_forward_ref)(x1, x2, params))
    err = float(jnp.max(jnp.abs(out - ref)))
    assert err < 2e-1, f"max abs err {err}"

    print("KERNEL_OK")
</pallas_src>

<mosaic_0001>
module attributes {stable_mosaic.version = 11 : i64} {
  func.func @kernel(%arg0: i32, %arg1: memref<1x32x8xbf16, #tpu.memory_space<vmem>>, %arg2: memref<1x4x324xbf16, #tpu.memory_space<vmem>>, %arg3: memref<8x18xbf16, #tpu.memory_space<vmem>>, %arg4: memref<9x4x4xbf16, #tpu.memory_space<vmem>>, %arg5: memref<9x4x4xbf16, #tpu.memory_space<vmem>>, %arg6: memref<4x1xf32, #tpu.memory_space<vmem>>, %arg7: memref<4x1xf32, #tpu.memory_space<vmem>>, %arg8: memref<9x4x4xbf16, #tpu.memory_space<vmem>>, %arg9: memref<4x1xf32, #tpu.memory_space<vmem>>, %arg10: memref<4x1xf32, #tpu.memory_space<vmem>>, %arg11: memref<1x324xf32, #tpu.memory_space<vmem>>, %arg12: memref<1x4x324xf32, #tpu.memory_space<vmem>>) attributes {dimension_semantics = [#tpu.dimension_semantics<parallel>], iteration_bounds = array<i64: 2>, scalar_prefetch = 0 : i64, scratch_operands = 0 : i64, tpu.core_type = #tpu.core_type<tc>, window_params = [{transform_indices = @transform_0, window_bounds = array<i64: 1, 32, 8>}, {transform_indices = @transform_1, window_bounds = array<i64: 1, 4, 324>}, {pipeline_mode = #tpu.pipeline_mode<synchronous>, transform_indices = @transform_2, window_bounds = array<i64: 8, 18>}, {pipeline_mode = #tpu.pipeline_mode<synchronous>, transform_indices = @transform_3, window_bounds = array<i64: 9, 4, 4>}, {pipeline_mode = #tpu.pipeline_mode<synchronous>, transform_indices = @transform_4, window_bounds = array<i64: 9, 4, 4>}, {pipeline_mode = #tpu.pipeline_mode<synchronous>, transform_indices = @transform_5, window_bounds = array<i64: 4, 1>}, {pipeline_mode = #tpu.pipeline_mode<synchronous>, transform_indices = @transform_6, window_bounds = array<i64: 4, 1>}, {pipeline_mode = #tpu.pipeline_mode<synchronous>, transform_indices = @transform_7, window_bounds = array<i64: 9, 4, 4>}, {pipeline_mode = #tpu.pipeline_mode<synchronous>, transform_indices = @transform_8, window_bounds = array<i64: 4, 1>}, {pipeline_mode = #tpu.pipeline_mode<synchronous>, transform_indices = @transform_9, window_bounds = array<i64: 4, 1>}, {pipeline_mode = #tpu.pipeline_mode<synchronous>, transform_indices = @transform_10, window_bounds = array<i64: 1, 324>}, {transform_indices = @transform_11, window_bounds = array<i64: 1, 4, 324>}]} {
    %c0 = arith.constant 0 : index
    %c0_0 = arith.constant 0 : index
    %c0_1 = arith.constant 0 : index
    %0 = vector.load %arg1[%c0, %c0_0, %c0_1] : memref<1x32x8xbf16, #tpu.memory_space<vmem>>, vector<1x32x8xbf16>
    %1 = vector.shape_cast %0 : vector<1x32x8xbf16> to vector<32x8xbf16>
    %c0_2 = arith.constant 0 : index
    %c0_3 = arith.constant 0 : index
    %2 = vector.load %arg3[%c0_2, %c0_3] : memref<8x18xbf16, #tpu.memory_space<vmem>>, vector<8x18xbf16>
    %cst = arith.constant dense<0.000000e+00> : vector<32x18xf32>
    %3 = tpu.matmul %1, %2, %cst {dimension_numbers = #tpu.dot_dimension_numbers<[1], [0], [0], [1], [0, 0, 1, 1], [], []>} : vector<32x8xbf16>, vector<8x18xbf16>, vector<32x18xf32> -> vector<32x18xf32>
    %cst_4 = arith.constant 0.000000e+00 : bf16
    %4 = vector.broadcast %cst_4 : bf16 to vector<4x18xbf16>
    %5 = vector.extract_strided_slice %3 {offsets = [0, 0], sizes = [4, 18], strides = [1, 1]} : vector<32x18xf32> to vector<4x18xf32>
    %cst_5 = arith.constant 1.000000e+00 : f32
    %6 = vector.broadcast %cst_5 : f32 to vector<4x18xf32>
    %7 = arith.mulf %5, %6 : vector<4x18xf32>
    %8 = arith.truncf %7 : vector<4x18xf32> to vector<4x18xbf16>
    %9 = vector.extract_strided_slice %3 {offsets = [0, 0], sizes = [4, 18], strides = [1, 1]} : vector<32x18xf32> to vector<4x18xf32>
    %cst_6 = arith.constant 0.533333361 : f32
    %10 = vector.broadcast %cst_6 : f32 to vector<4x18xf32>
    %11 = arith.mulf %9, %10 : vector<4x18xf32>
    %12 = vector.extract_strided_slice %3 {offsets = [4, 0], sizes = [4, 18], strides = [1, 1]} : vector<32x18xf32> to vector<4x18xf32>
    %cst_7 = arith.constant 0.466666669 : f32
    %13 = vector.broadcast %cst_7 : f32 to vector<4x18xf32>
    %14 = arith.mulf %12, %13 : vector<4x18xf32>
    %15 = arith.addf %11, %14 : vector<4x18xf32>
    %16 = arith.truncf %15 : vector<4x18xf32> to vector<4x18xbf16>
    %17 = vector.extract_strided_slice %3 {offsets = [0, 0], sizes = [4, 18], strides = [1, 1]} : vector<32x18xf32> to vector<4x18xf32>
    %cst_8 = arith.constant 0.0666666701 : f32
    %18 = vector.broadcast %cst_8 : f32 to vector<4x18xf32>
    %19 = arith.mulf %17, %18 : vector<4x18xf32>
    %20 = vector.extract_strided_slice %3 {offsets = [4, 0], sizes = [4, 18], strides = [1, 1]} : vector<32x18xf32> to vector<4x18xf32>
    %cst_9 = arith.constant 0.933333337 : f32
    %21 = vector.broadcast %cst_9 : f32 to vector<4x18xf32>
    %22 = arith.mulf %20, %21 : vector<4x18xf32>
    %23 = arith.addf %19, %22 : vector<4x18xf32>
    %24 = arith.truncf %23 : vector<4x18xf32> to vector<4x18xbf16>
    %25 = vector.extract_strided_slice %3 {offsets = [4, 0], sizes = [4, 18], strides = [1, 1]} : vector<32x18xf32> to vector<4x18xf32>
    %cst_10 = arith.constant 6.000000e-01 : f32
    %26 = vector.broadcast %cst_10 : f32 to vector<4x18xf32>
    %27 = arith.mulf %25, %26 : vector<4x18xf32>
    %28 = vector.extract_strided_slice %3 {offsets = [8, 0], sizes = [4, 18], strides = [1, 1]} : vector<32x18xf32> to vector<4x18xf32>
    %cst_11 = arith.constant 4.000000e-01 : f32
    %29 = vector.broadcast %cst_11 : f32 to vector<4x18xf32>
    %30 = arith.mulf %28, %29 : vector<4x18xf32>
    %31 = arith.addf %27, %30 : vector<4x18xf32>
    %32 = arith.truncf %31 : vector<4x18xf32> to vector<4x18xbf16>
    %33 = vector.extract_strided_slice %3 {offsets = [4, 0], sizes = [4, 18], strides = [1, 1]} : vector<32x18xf32> to vector<4x18xf32>
    %cst_12 = arith.constant 0.13333334 : f32
    %34 = vector.broadcast %cst_12 : f32 to vector<4x18xf32>
    %35 = arith.mulf %33, %34 : vector<4x18xf32>
    %36 = vector.extract_strided_slice %3 {offsets = [8, 0], sizes = [4, 18], strides = [1, 1]} : vector<32x18xf32> to vector<4x18xf32>
    %cst_13 = arith.constant 0.866666674 : f32
    %37 = vector.broadcast %cst_13 : f32 to vector<4x18xf32>
    %38 = arith.mulf %36, %37 : vector<4x18xf32>
    %39 = arith.addf %35, %38 : vector<4x18xf32>
    %40 = arith.truncf %39 : vector<4x18xf32> to vector<4x18xbf16>
    %41 = vector.extract_strided_slice %3 {offsets = [8, 0], sizes = [4, 18], strides = [1, 1]} : vector<32x18xf32> to vector<4x18xf32>
    %cst_14 = arith.constant 0.666666686 : f32
    %42 = vector.broadcast %cst_14 : f32 to vector<4x18xf32>
    %43 = arith.mulf %41, %42 : vector<4x18xf32>
    %44 = vector.extract_strided_slice %3 {offsets = [12, 0], sizes = [4, 18], strides = [1, 1]} : vector<32x18xf32> to vector<4x18xf32>
    %cst_15 = arith.constant 0.333333343 : f32
    %45 = vector.broadcast %cst_15 : f32 to vector<4x18xf32>
    %46 = arith.mulf %44, %45 : vector<4x18xf32>
    %47 = arith.addf %43, %46 : vector<4x18xf32>
    %48 = arith.truncf %47 : vector<4x18xf32> to vector<4x18xbf16>
    %49 = vector.extract_strided_slice %3 {offsets = [8, 0], sizes = [4, 18], strides = [1, 1]} : vector<32x18xf32> to vector<4x18xf32>
    %cst_16 = arith.constant 2.000000e-01 : f32
    %50 = vector.broadcast %cst_16 : f32 to vector<4x18xf32>
    %51 = arith.mulf %49, %50 : vector<4x18xf32>
    %52 = vector.extract_strided_slice %3 {offsets = [12, 0], sizes = [4, 18], strides = [1, 1]} : vector<32x18xf32> to vector<4x18xf32>
    %cst_17 = arith.constant 8.000000e-01 : f32
    %53 = vector.broadcast %cst_17 : f32 to vector<4x18xf32>
    %54 = arith.mulf %52, %53 : vector<4x18xf32>
    %55 = arith.addf %51, %54 : vector<4x18xf32>
    %56 = arith.truncf %55 : vector<4x18xf32> to vector<4x18xbf16>
    %57 = vector.extract_strided_slice %3 {offsets = [12, 0], sizes = [4, 18], strides = [1, 1]} : vector<32x18xf32> to vector<4x18xf32>
    %cst_18 = arith.constant 0.733333349 : f32
    %58 = vector.broadcast %cst_18 : f32 to vector<4x18xf32>
    %59 = arith.mulf %57, %58 : vector<4x18xf32>
    %60 = vector.extract_strided_slice %3 {offsets = [16, 0], sizes = [4, 18], strides = [1, 1]} : vector<32x18xf32> to vector<4x18xf32>
    %cst_19 = arith.constant 0.266666681 : f32
    %61 = vector.broadcast %cst_19 : f32 to vector<4x18xf32>
    %62 = arith.mulf %60, %61 : vector<4x18xf32>
    %63 = arith.addf %59, %62 : vector<4x18xf32>
    %64 = arith.truncf %63 : vector<4x18xf32> to vector<4x18xbf16>
    %65 = vector.extract_strided_slice %3 {offsets = [12, 0], sizes = [4, 18], strides = [1, 1]} : vector<32x18xf32> to vector<4x18xf32>
    %cst_20 = arith.constant 0.266666681 : f32
    %66 = vector.broadcast %cst_20 : f32 to vector<4x18xf32>
    %67 = arith.mulf %65, %66 : vector<4x18xf32>
    %68 = vector.extract_strided_slice %3 {offsets = [16, 0], sizes = [4, 18], strides = [1, 1]} : vector<32x18xf32> to vector<4x18xf32>
    %cst_21 = arith.constant 0.733333349 : f32
    %69 = vector.broadcast %cst_21 : f32 to vector<4x18xf32>
    %70 = arith.mulf %68, %69 : vector<4x18xf32>
    %71 = arith.addf %67, %70 : vector<4x18xf32>
    %72 = arith.truncf %71 : vector<4x18xf32> to vector<4x18xbf16>
    %73 = vector.extract_strided_slice %3 {offsets = [16, 0], sizes = [4, 18], strides = [1, 1]} : vector<32x18xf32> to vector<4x18xf32>
    %cst_22 = arith.constant 8.000000e-01 : f32
    %74 = vector.broadcast %cst_22 : f32 to vector<4x18xf32>
    %75 = arith.mulf %73, %74 : vector<4x18xf32>
    %76 = vector.extract_strided_slice %3 {offsets = [20, 0], sizes = [4, 18], strides = [1, 1]} : vector<32x18xf32> to vector<4x18xf32>
    %cst_23 = arith.constant 2.000000e-01 : f32
    %77 = vector.broadcast %cst_23 : f32 to vector<4x18xf32>
    %78 = arith.mulf %76, %77 : vector<4x18xf32>
    %79 = arith.addf %75, %78 : vector<4x18xf32>
    %80 = arith.truncf %79 : vector<4x18xf32> to vector<4x18xbf16>
    %81 = vector.extract_strided_slice %3 {offsets = [16, 0], sizes = [4, 18], strides = [1, 1]} : vector<32x18xf32> to vector<4x18xf32>
    %cst_24 = arith.constant 0.333333343 : f32
    %82 = vector.broadcast %cst_24 : f32 to vector<4x18xf32>
    %83 = arith.mulf %81, %82 : vector<4x18xf32>
    %84 = vector.extract_strided_slice %3 {offsets = [20, 0], sizes = [4, 18], strides = [1, 1]} : vector<32x18xf32> to vector<4x18xf32>
    %cst_25 = arith.constant 0.666666686 : f32
    %85 = vector.broadcast %cst_25 : f32 to vector<4x18xf32>
    %86 = arith.mulf %84, %85 : vector<4x18xf32>
    %87 = arith.addf %83, %86 : vector<4x18xf32>
    %88 = arith.truncf %87 : vector<4x18xf32> to vector<4x18xbf16>
    %89 = vector.extract_strided_slice %3 {offsets = [20, 0], sizes = [4, 18], strides = [1, 1]} : vector<32x18xf32> to vector<4x18xf32>
    %cst_26 = arith.constant 0.866666674 : f32
    %90 = vector.broadcast %cst_26 : f32 to vector<4x18xf32>
    %91 = arith.mulf %89, %90 : vector<4x18xf32>
    %92 = vector.extract_strided_slice %3 {offsets = [24, 0], sizes = [4, 18], strides = [1, 1]} : vector<32x18xf32> to vector<4x18xf32>
    %cst_27 = arith.constant 0.13333334 : f32
    %93 = vector.broadcast %cst_27 : f32 to vector<4x18xf32>
    %94 = arith.mulf %92, %93 : vector<4x18xf32>
    %95 = arith.addf %91, %94 : vector<4x18xf32>
    %96 = arith.truncf %95 : vector<4x18xf32> to vector<4x18xbf16>
    %97 = vector.extract_strided_slice %3 {offsets = [20, 0], sizes = [4, 18], strides = [1, 1]} : vector<32x18xf32> to vector<4x18xf32>
    %cst_28 = arith.constant 4.000000e-01 : f32
    %98 = vector.broadcast %cst_28 : f32 to vector<4x18xf32>
    %99 = arith.mulf %97, %98 : vector<4x18xf32>
    %100 = vector.extract_strided_slice %3 {offsets = [24, 0], sizes = [4, 18], strides = [1, 1]} : vector<32x18xf32> to vector<4x18xf32>
    %cst_29 = arith.constant 6.000000e-01 : f32
    %101 = vector.broadcast %cst_29 : f32 to vector<4x18xf32>
    %102 = arith.mulf %100, %101 : vector<4x18xf32>
    %103 = arith.addf %99, %102 : vector<4x18xf32>
    %104 = arith.truncf %103 : vector<4x18xf32> to vector<4x18xbf16>
    %105 = vector.extract_strided_slice %3 {offsets = [24, 0], sizes = [4, 18], strides = [1, 1]} : vector<32x18xf32> to vector<4x18xf32>
    %cst_30 = arith.constant 0.933333337 : f32
    %106 = vector.broadcast %cst_30 : f32 to vector<4x18xf32>
    %107 = arith.mulf %105, %106 : vector<4x18xf32>
    %108 = vector.extract_strided_slice %3 {offsets = [28, 0], sizes = [4, 18], strides = [1, 1]} : vector<32x18xf32> to vector<4x18xf32>
    %cst_31 = arith.constant 0.0666666701 : f32
    %109 = vector.broadcast %cst_31 : f32 to vector<4x18xf32>
    %110 = arith.mulf %108, %109 : vector<4x18xf32>
    %111 = arith.addf %107, %110 : vector<4x18xf32>
    %112 = arith.truncf %111 : vector<4x18xf32> to vector<4x18xbf16>
    %113 = vector.extract_strided_slice %3 {offsets = [24, 0], sizes = [4, 18], strides = [1, 1]} : vector<32x18xf32> to vector<4x18xf32>
    %cst_32 = arith.constant 0.466666669 : f32
    %114 = vector.broadcast %cst_32 : f32 to vector<4x18xf32>
    %115 = arith.mulf %113, %114 : vector<4x18xf32>
    %116 = vector.extract_strided_slice %3 {offsets = [28, 0], sizes = [4, 18], strides = [1, 1]} : vector<32x18xf32> to vector<4x18xf32>
    %cst_33 = arith.constant 0.533333361 : f32
    %117 = vector.broadcast %cst_33 : f32 to vector<4x18xf32>
    %118 = arith.mulf %116, %117 : vector<4x18xf32>
    %119 = arith.addf %115, %118 : vector<4x18xf32>
    %120 = arith.truncf %119 : vector<4x18xf32> to vector<4x18xbf16>
    %121 = vector.extract_strided_slice %3 {offsets = [28, 0], sizes = [4, 18], strides = [1, 1]} : vector<32x18xf32> to vector<4x18xf32>
    %cst_34 = arith.constant 1.000000e+00 : f32
    %122 = vector.broadcast %cst_34 : f32 to vector<4x18xf32>
    %123 = arith.mulf %121, %122 : vector<4x18xf32>
    %124 = arith.truncf %123 : vector<4x18xf32> to vector<4x18xbf16>
    %125 = tpu.concatenate %4, %8, %16, %24, %32, %40, %48, %56, %64, %72, %80, %88, %96, %104, %112, %120 in 1 : vector<4x18xbf16>, vector<4x18xbf16>, vector<4x18xbf16>, vector<4x18xbf16>, vector<4x18xbf16>, vector<4x18xbf16>, vector<4x18xbf16>, vector<4x18xbf16>, vector<4x18xbf16>, vector<4x18xbf16>, vector<4x18xbf16>, vector<4x18xbf16>, vector<4x18xbf16>, vector<4x18xbf16>, vector<4x18xbf16>, vector<4x18xbf16> -> vector<4x288xbf16>
    %126 = tpu.concatenate %124, %4 in 1 : vector<4x18xbf16>, vector<4x18xbf16> -> vector<4x36xbf16>
    %127 = tpu.concatenate %125, %126 in 1 : vector<4x288xbf16>, vector<4x36xbf16> -> vector<4x324xbf16>
    %c0_35 = arith.constant 0 : index
    %c0_36 = arith.constant 0 : index
    %c0_37 = arith.constant 0 : index
    %128 = vector.load %arg2[%c0_35, %c0_36, %c0_37] : memref<1x4x324xbf16, #tpu.memory_space<vmem>>, vector<1x4x324xbf16>
    %129 = vector.shape_cast %128 : vector<1x4x324xbf16> to vector<4x324xbf16>
    %cst_38 = arith.constant 0.000000e+00 : f32
    %130 = vector.broadcast %cst_38 : f32 to vector<4x324xf32>
    %c0_39 = arith.constant 0 : index
    %c0_40 = arith.constant 0 : index
    %c0_41 = arith.constant 0 : index
    %131 = vector.load %arg4[%c0_39, %c0_40, %c0_41] : memref<9x4x4xbf16, #tpu.memory_space<vmem>>, vector<1x4x4xbf16>
    %132 = vector.shape_cast %131 : vector<1x4x4xbf16> to vector<4x4xbf16>
    %133 = vector.extract_strided_slice %129 {offsets = [0, 305], sizes = [4, 19], strides = [1, 1]} : vector<4x324xbf16> to vector<4x19xbf16>
    %134 = vector.extract_strided_slice %129 {offsets = [0, 0], sizes = [4, 305], strides = [1, 1]} : vector<4x324xbf16> to vector<4x305xbf16>
    %135 = tpu.concatenate %133, %134 in 1 : vector<4x19xbf16>, vector<4x305xbf16> -> vector<4x324xbf16>
    %cst_42 = arith.constant dense<0.000000e+00> : vector<4x324xf32>
    %136 = tpu.matmul %132, %135, %cst_42 {dimension_numbers = #tpu.dot_dimension_numbers<[1], [0], [0], [1], [0, 0, 1, 1], [], []>} : vector<4x4xbf16>, vector<4x324xbf16>, vector<4x324xf32> -> vector<4x324xf32>
    %137 = arith.addf %130, %136 : vector<4x324xf32>
    %c0_43 = arith.constant 0 : index
    %c0_44 = arith.constant 0 : index
    %c0_45 = arith.constant 0 : index
    %138 = vector.load %arg5[%c0_43, %c0_44, %c0_45] : memref<9x4x4xbf16, #tpu.memory_space<vmem>>, vector<1x4x4xbf16>
    %139 = vector.shape_cast %138 : vector<1x4x4xbf16> to vector<4x4xbf16>
    %140 = vector.extract_strided_slice %127 {offsets = [0, 305], sizes = [4, 19], strides = [1, 1]} : vector<4x324xbf16> to vector<4x19xbf16>
    %141 = vector.extract_strided_slice %127 {offsets = [0, 0], sizes = [4, 305], strides = [1, 1]} : vector<4x324xbf16> to vector<4x305xbf16>
    %142 = tpu.concatenate %140, %141 in 1 : vector<4x19xbf16>, vector<4x305xbf16> -> vector<4x324xbf16>
    %cst_46 = arith.constant dense<0.000000e+00> : vector<4x324xf32>
    %143 = tpu.matmul %139, %142, %cst_46 {dimension_numbers = #tpu.dot_dimension_numbers<[1], [0], [0], [1], [0, 0, 1, 1], [], []>} : vector<4x4xbf16>, vector<4x324xbf16>, vector<4x324xf32> -> vector<4x324xf32>
    %144 = arith.addf %137, %143 : vector<4x324xf32>
    %c1 = arith.constant 1 : index
    %c0_47 = arith.constant 0 : index
    %c0_48 = arith.constant 0 : index
    %145 = vector.load %arg4[%c1, %c0_47, %c0_48] : memref<9x4x4xbf16, #tpu.memory_space<vmem>>, vector<1x4x4xbf16>
    %146 = vector.shape_cast %145 : vector<1x4x4xbf16> to vector<4x4xbf16>
    %147 = vector.extract_strided_slice %129 {offsets = [0, 306], sizes = [4, 18], strides = [1, 1]} : vector<4x324xbf16> to vector<4x18xbf16>
    %148 = vector.extract_strided_slice %129 {offsets = [0, 0], sizes = [4, 306], strides = [1, 1]} : vector<4x324xbf16> to vector<4x306xbf16>
    %149 = tpu.concatenate %147, %148 in 1 : vector<4x18xbf16>, vector<4x306xbf16> -> vector<4x324xbf16>
    %cst_49 = arith.constant dense<0.000000e+00> : vector<4x324xf32>
    %150 = tpu.matmul %146, %149, %cst_49 {dimension_numbers = #tpu.dot_dimension_numbers<[1], [0], [0], [1], [0, 0, 1, 1], [], []>} : vector<4x4xbf16>, vector<4x324xbf16>, vector<4x324xf32> -> vector<4x324xf32>
    %151 = arith.addf %144, %150 : vector<4x324xf32>
    %c1_50 = arith.constant 1 : index
    %c0_51 = arith.constant 0 : index
    %c0_52 = arith.constant 0 : index
    %152 = vector.load %arg5[%c1_50, %c0_51, %c0_52] : memref<9x4x4xbf16, #tpu.memory_space<vmem>>, vector<1x4x4xbf16>
    %153 = vector.shape_cast %152 : vector<1x4x4xbf16> to vector<4x4xbf16>
    %154 = vector.extract_strided_slice %127 {offsets = [0, 306], sizes = [4, 18], strides = [1, 1]} : vector<4x324xbf16> to vector<4x18xbf16>
    %155 = vector.extract_strided_slice %127 {offsets = [0, 0], sizes = [4, 306], strides = [1, 1]} : vector<4x324xbf16> to vector<4x306xbf16>
    %156 = tpu.concatenate %154, %155 in 1 : vector<4x18xbf16>, vector<4x306xbf16> -> vector<4x324xbf16>
    %cst_53 = arith.constant dense<0.000000e+00> : vector<4x324xf32>
    %157 = tpu.matmul %153, %156, %cst_53 {dimension_numbers = #tpu.dot_dimension_numbers<[1], [0], [0], [1], [0, 0, 1, 1], [], []>} : vector<4x4xbf16>, vector<4x324xbf16>, vector<4x324xf32> -> vector<4x324xf32>
    %158 = arith.addf %151, %157 : vector<4x324xf32>
    %c2 = arith.constant 2 : index
    %c0_54 = arith.constant 0 : index
    %c0_55 = arith.constant 0 : index
    %159 = vector.load %arg4[%c2, %c0_54, %c0_55] : memref<9x4x4xbf16, #tpu.memory_space<vmem>>, vector<1x4x4xbf16>
    %160 = vector.shape_cast %159 : vector<1x4x4xbf16> to vector<4x4xbf16>
    %161 = vector.extract_strided_slice %129 {offsets = [0, 307], sizes = [4, 17], strides = [1, 1]} : vector<4x324xbf16> to vector<4x17xbf16>
    %162 = vector.extract_strided_slice %129 {offsets = [0, 0], sizes = [4, 307], strides = [1, 1]} : vector<4x324xbf16> to vector<4x307xbf16>
    %163 = tpu.concatenate %161, %162 in 1 : vector<4x17xbf16>, vector<4x307xbf16> -> vector<4x324xbf16>
    %cst_56 = arith.constant dense<0.000000e+00> : vector<4x324xf32>
    %164 = tpu.matmul %160, %163, %cst_56 {dimension_numbers = #tpu.dot_dimension_numbers<[1], [0], [0], [1], [0, 0, 1, 1], [], []>} : vector<4x4xbf16>, vector<4x324xbf16>, vector<4x324xf32> -> vector<4x324xf32>
    %165 = arith.addf %158, %164 : vector<4x324xf32>
    %c2_57 = arith.constant 2 : index
    %c0_58 = arith.constant 0 : index
    %c0_59 = arith.constant 0 : index
    %166 = vector.load %arg5[%c2_57, %c0_58, %c0_59] : memref<9x4x4xbf16, #tpu.memory_space<vmem>>, vector<1x4x4xbf16>
    %167 = vector.shape_cast %166 : vector<1x4x4xbf16> to vector<4x4xbf16>
    %168 = vector.extract_strided_slice %127 {offsets = [0, 307], sizes = [4, 17], strides = [1, 1]} : vector<4x324xbf16> to vector<4x17xbf16>
    %169 = vector.extract_strided_slice %127 {offsets = [0, 0], sizes = [4, 307], strides = [1, 1]} : vector<4x324xbf16> to vector<4x307xbf16>
    %170 = tpu.concatenate %168, %169 in 1 : vector<4x17xbf16>, vector<4x307xbf16> -> vector<4x324xbf16>
    %cst_60 = arith.constant dense<0.000000e+00> : vector<4x324xf32>
    %171 = tpu.matmul %167, %170, %cst_60 {dimension_numbers = #tpu.dot_dimension_numbers<[1], [0], [0], [1], [0, 0, 1, 1], [], []>} : vector<4x4xbf16>, vector<4x324xbf16>, vector<4x324xf32> -> vector<4x324xf32>
    %172 = arith.addf %165, %171 : vector<4x324xf32>
    %c3 = arith.constant 3 : index
    %c0_61 = arith.constant 0 : index
    %c0_62 = arith.constant 0 : index
    %173 = vector.load %arg4[%c3, %c0_61, %c0_62] : memref<9x4x4xbf16, #tpu.memory_space<vmem>>, vector<1x4x4xbf16>
    %174 = vector.shape_cast %173 : vector<1x4x4xbf16> to vector<4x4xbf16>
    %175 = vector.extract_strided_slice %129 {offsets = [0, 323], sizes = [4, 1], strides = [1, 1]} : vector<4x324xbf16> to vector<4x1xbf16>
    %176 = vector.extract_strided_slice %129 {offsets = [0, 0], sizes = [4, 323], strides = [1, 1]} : vector<4x324xbf16> to vector<4x323xbf16>
    %177 = tpu.concatenate %175, %176 in 1 : vector<4x1xbf16>, vector<4x323xbf16> -> vector<4x324xbf16>
    %cst_63 = arith.constant dense<0.000000e+00> : vector<4x324xf32>
    %178 = tpu.matmul %174, %177, %cst_63 {dimension_numbers = #tpu.dot_dimension_numbers<[1], [0], [0], [1], [0, 0, 1, 1], [], []>} : vector<4x4xbf16>, vector<4x324xbf16>, vector<4x324xf32> -> vector<4x324xf32>
    %179 = arith.addf %172, %178 : vector<4x324xf32>
    %c3_64 = arith.constant 3 : index
    %c0_65 = arith.constant 0 : index
    %c0_66 = arith.constant 0 : index
    %180 = vector.load %arg5[%c3_64, %c0_65, %c0_66] : memref<9x4x4xbf16, #tpu.memory_space<vmem>>, vector<1x4x4xbf16>
    %181 = vector.shape_cast %180 : vector<1x4x4xbf16> to vector<4x4xbf16>
    %182 = vector.extract_strided_slice %127 {offsets = [0, 323], sizes = [4, 1], strides = [1, 1]} : vector<4x324xbf16> to vector<4x1xbf16>
    %183 = vector.extract_strided_slice %127 {offsets = [0, 0], sizes = [4, 323], strides = [1, 1]} : vector<4x324xbf16> to vector<4x323xbf16>
    %184 = tpu.concatenate %182, %183 in 1 : vector<4x1xbf16>, vector<4x323xbf16> -> vector<4x324xbf16>
    %cst_67 = arith.constant dense<0.000000e+00> : vector<4x324xf32>
    %185 = tpu.matmul %181, %184, %cst_67 {dimension_numbers = #tpu.dot_dimension_numbers<[1], [0], [0], [1], [0, 0, 1, 1], [], []>} : vector<4x4xbf16>, vector<4x324xbf16>, vector<4x324xf32> -> vector<4x324xf32>
    %186 = arith.addf %179, %185 : vector<4x324xf32>
    %c4 = arith.constant 4 : index
    %c0_68 = arith.constant 0 : index
    %c0_69 = arith.constant 0 : index
    %187 = vector.load %arg4[%c4, %c0_68, %c0_69] : memref<9x4x4xbf16, #tpu.memory_space<vmem>>, vector<1x4x4xbf16>
    %188 = vector.shape_cast %187 : vector<1x4x4xbf16> to vector<4x4xbf16>
    %cst_70 = arith.constant dense<0.000000e+00> : vector<4x324xf32>
    %189 = tpu.matmul %188, %129, %cst_70 {dimension_numbers = #tpu.dot_dimension_numbers<[1], [0], [0], [1], [0, 0, 1, 1], [], []>} : vector<4x4xbf16>, vector<4x324xbf16>, vector<4x324xf32> -> vector<4x324xf32>
    %190 = arith.addf %186, %189 : vector<4x324xf32>
    %c4_71 = arith.constant 4 : index
    %c0_72 = arith.constant 0 : index
    %c0_73 = arith.constant 0 : index
    %191 = vector.load %arg5[%c4_71, %c0_72, %c0_73] : memref<9x4x4xbf16, #tpu.memory_space<vmem>>, vector<1x4x4xbf16>
    %192 = vector.shape_cast %191 : vector<1x4x4xbf16> to vector<4x4xbf16>
    %cst_74 = arith.constant dense<0.000000e+00> : vector<4x324xf32>
    %193 = tpu.matmul %192, %127, %cst_74 {dimension_numbers = #tpu.dot_dimension_numbers<[1], [0], [0], [1], [0, 0, 1, 1], [], []>} : vector<4x4xbf16>, vector<4x324xbf16>, vector<4x324xf32> -> vector<4x324xf32>
    %194 = arith.addf %190, %193 : vector<4x324xf32>
    %c5 = arith.constant 5 : index
    %c0_75 = arith.constant 0 : index
    %c0_76 = arith.constant 0 : index
    %195 = vector.load %arg4[%c5, %c0_75, %c0_76] : memref<9x4x4xbf16, #tpu.memory_space<vmem>>, vector<1x4x4xbf16>
    %196 = vector.shape_cast %195 : vector<1x4x4xbf16> to vector<4x4xbf16>
    %197 = vector.extract_strided_slice %129 {offsets = [0, 1], sizes = [4, 323], strides = [1, 1]} : vector<4x324xbf16> to vector<4x323xbf16>
    %198 = vector.extract_strided_slice %129 {offsets = [0, 0], sizes = [4, 1], strides = [1, 1]} : vector<4x324xbf16> to vector<4x1xbf16>
    %199 = tpu.concatenate %197, %198 in 1 : vector<4x323xbf16>, vector<4x1xbf16> -> vector<4x324xbf16>
    %cst_77 = arith.constant dense<0.000000e+00> : vector<4x324xf32>
    %200 = tpu.matmul %196, %199, %cst_77 {dimension_numbers = #tpu.dot_dimension_numbers<[1], [0], [0], [1], [0, 0, 1, 1], [], []>} : vector<4x4xbf16>, vector<4x324xbf16>, vector<4x324xf32> -> vector<4x324xf32>
    %201 = arith.addf %194, %200 : vector<4x324xf32>
    %c5_78 = arith.constant 5 : index
    %c0_79 = arith.constant 0 : index
    %c0_80 = arith.constant 0 : index
    %202 = vector.load %arg5[%c5_78, %c0_79, %c0_80] : memref<9x4x4xbf16, #tpu.memory_space<vmem>>, vector<1x4x4xbf16>
    %203 = vector.shape_cast %202 : vector<1x4x4xbf16> to vector<4x4xbf16>
    %204 = vector.extract_strided_slice %127 {offsets = [0, 1], sizes = [4, 323], strides = [1, 1]} : vector<4x324xbf16> to vector<4x323xbf16>
    %205 = vector.extract_strided_slice %127 {offsets = [0, 0], sizes = [4, 1], strides = [1, 1]} : vector<4x324xbf16> to vector<4x1xbf16>
    %206 = tpu.concatenate %204, %205 in 1 : vector<4x323xbf16>, vector<4x1xbf16> -> vector<4x324xbf16>
    %cst_81 = arith.constant dense<0.000000e+00> : vector<4x324xf32>
    %207 = tpu.matmul %203, %206, %cst_81 {dimension_numbers = #tpu.dot_dimension_numbers<[1], [0], [0], [1], [0, 0, 1, 1], [], []>} : vector<4x4xbf16>, vector<4x324xbf16>, vector<4x324xf32> -> vector<4x324xf32>
    %208 = arith.addf %201, %207 : vector<4x324xf32>
    %c6 = arith.constant 6 : index
    %c0_82 = arith.constant 0 : index
    %c0_83 = arith.constant 0 : index
    %209 = vector.load %arg4[%c6, %c0_82, %c0_83] : memref<9x4x4xbf16, #tpu.memory_space<vmem>>, vector<1x4x4xbf16>
    %210 = vector.shape_cast %209 : vector<1x4x4xbf16> to vector<4x4xbf16>
    %211 = vector.extract_strided_slice %129 {offsets = [0, 17], sizes = [4, 307], strides = [1, 1]} : vector<4x324xbf16> to vector<4x307xbf16>
    %212 = vector.extract_strided_slice %129 {offsets = [0, 0], sizes = [4, 17], strides = [1, 1]} : vector<4x324xbf16> to vector<4x17xbf16>
    %213 = tpu.concatenate %211, %212 in 1 : vector<4x307xbf16>, vector<4x17xbf16> -> vector<4x324xbf16>
    %cst_84 = arith.constant dense<0.000000e+00> : vector<4x324xf32>
    %214 = tpu.matmul %210, %213, %cst_84 {dimension_numbers = #tpu.dot_dimension_numbers<[1], [0], [0], [1], [0, 0, 1, 1], [], []>} : vector<4x4xbf16>, vector<4x324xbf16>, vector<4x324xf32> -> vector<4x324xf32>
    %215 = arith.addf %208, %214 : vector<4x324xf32>
    %c6_85 = arith.constant 6 : index
    %c0_86 = arith.constant 0 : index
    %c0_87 = arith.constant 0 : index
    %216 = vector.load %arg5[%c6_85, %c0_86, %c0_87] : memref<9x4x4xbf16, #tpu.memory_space<vmem>>, vector<1x4x4xbf16>
    %217 = vector.shape_cast %216 : vector<1x4x4xbf16> to vector<4x4xbf16>
    %218 = vector.extract_strided_slice %127 {offsets = [0, 17], sizes = [4, 307], strides = [1, 1]} : vector<4x324xbf16> to vector<4x307xbf16>
    %219 = vector.extract_strided_slice %127 {offsets = [0, 0], sizes = [4, 17], strides = [1, 1]} : vector<4x324xbf16> to vector<4x17xbf16>
    %220 = tpu.concatenate %218, %219 in 1 : vector<4x307xbf16>, vector<4x17xbf16> -> vector<4x324xbf16>
    %cst_88 = arith.constant dense<0.000000e+00> : vector<4x324xf32>
    %221 = tpu.matmul %217, %220, %cst_88 {dimension_numbers = #tpu.dot_dimension_numbers<[1], [0], [0], [1], [0, 0, 1, 1], [], []>} : vector<4x4xbf16>, vector<4x324xbf16>, vector<4x324xf32> -> vector<4x324xf32>
    %222 = arith.addf %215, %221 : vector<4x324xf32>
    %c7 = arith.constant 7 : index
    %c0_89 = arith.constant 0 : index
    %c0_90 = arith.constant 0 : index
    %223 = vector.load %arg4[%c7, %c0_89, %c0_90] : memref<9x4x4xbf16, #tpu.memory_space<vmem>>, vector<1x4x4xbf16>
    %224 = vector.shape_cast %223 : vector<1x4x4xbf16> to vector<4x4xbf16>
    %225 = vector.extract_strided_slice %129 {offsets = [0, 18], sizes = [4, 306], strides = [1, 1]} : vector<4x324xbf16> to vector<4x306xbf16>
    %226 = vector.extract_strided_slice %129 {offsets = [0, 0], sizes = [4, 18], strides = [1, 1]} : vector<4x324xbf16> to vector<4x18xbf16>
    %227 = tpu.concatenate %225, %226 in 1 : vector<4x306xbf16>, vector<4x18xbf16> -> vector<4x324xbf16>
    %cst_91 = arith.constant dense<0.000000e+00> : vector<4x324xf32>
    %228 = tpu.matmul %224, %227, %cst_91 {dimension_numbers = #tpu.dot_dimension_numbers<[1], [0], [0], [1], [0, 0, 1, 1], [], []>} : vector<4x4xbf16>, vector<4x324xbf16>, vector<4x324xf32> -> vector<4x324xf32>
    %229 = arith.addf %222, %228 : vector<4x324xf32>
    %c7_92 = arith.constant 7 : index
    %c0_93 = arith.constant 0 : index
    %c0_94 = arith.constant 0 : index
    %230 = vector.load %arg5[%c7_92, %c0_93, %c0_94] : memref<9x4x4xbf16, #tpu.memory_space<vmem>>, vector<1x4x4xbf16>
    %231 = vector.shape_cast %230 : vector<1x4x4xbf16> to vector<4x4xbf16>
    %232 = vector.extract_strided_slice %127 {offsets = [0, 18], sizes = [4, 306], strides = [1, 1]} : vector<4x324xbf16> to vector<4x306xbf16>
    %233 = vector.extract_strided_slice %127 {offsets = [0, 0], sizes = [4, 18], strides = [1, 1]} : vector<4x324xbf16> to vector<4x18xbf16>
    %234 = tpu.concatenate %232, %233 in 1 : vector<4x306xbf16>, vector<4x18xbf16> -> vector<4x324xbf16>
    %cst_95 = arith.constant dense<0.000000e+00> : vector<4x324xf32>
    %235 = tpu.matmul %231, %234, %cst_95 {dimension_numbers = #tpu.dot_dimension_numbers<[1], [0], [0], [1], [0, 0, 1, 1], [], []>} : vector<4x4xbf16>, vector<4x324xbf16>, vector<4x324xf32> -> vector<4x324xf32>
    %236 = arith.addf %229, %235 : vector<4x324xf32>
    %c8 = arith.constant 8 : index
    %c0_96 = arith.constant 0 : index
    %c0_97 = arith.constant 0 : index
    %237 = vector.load %arg4[%c8, %c0_96, %c0_97] : memref<9x4x4xbf16, #tpu.memory_space<vmem>>, vector<1x4x4xbf16>
    %238 = vector.shape_cast %237 : vector<1x4x4xbf16> to vector<4x4xbf16>
    %239 = vector.extract_strided_slice %129 {offsets = [0, 19], sizes = [4, 305], strides = [1, 1]} : vector<4x324xbf16> to vector<4x305xbf16>
    %240 = vector.extract_strided_slice %129 {offsets = [0, 0], sizes = [4, 19], strides = [1, 1]} : vector<4x324xbf16> to vector<4x19xbf16>
    %241 = tpu.concatenate %239, %240 in 1 : vector<4x305xbf16>, vector<4x19xbf16> -> vector<4x324xbf16>
    %cst_98 = arith.constant dense<0.000000e+00> : vector<4x324xf32>
    %242 = tpu.matmul %238, %241, %cst_98 {dimension_numbers = #tpu.dot_dimension_numbers<[1], [0], [0], [1], [0, 0, 1, 1], [], []>} : vector<4x4xbf16>, vector<4x324xbf16>, vector<4x324xf32> -> vector<4x324xf32>
    %243 = arith.addf %236, %242 : vector<4x324xf32>
    %c8_99 = arith.constant 8 : index
    %c0_100 = arith.constant 0 : index
    %c0_101 = arith.constant 0 : index
    %244 = vector.load %arg5[%c8_99, %c0_100, %c0_101] : memref<9x4x4xbf16, #tpu.memory_space<vmem>>, vector<1x4x4xbf16>
    %245 = vector.shape_cast %244 : vector<1x4x4xbf16> to vector<4x4xbf16>
    %246 = vector.extract_strided_slice %127 {offsets = [0, 19], sizes = [4, 305], strides = [1, 1]} : vector<4x324xbf16> to vector<4x305xbf16>
    %247 = vector.extract_strided_slice %127 {offsets = [0, 0], sizes = [4, 19], strides = [1, 1]} : vector<4x324xbf16> to vector<4x19xbf16>
    %248 = tpu.concatenate %246, %247 in 1 : vector<4x305xbf16>, vector<4x19xbf16> -> vector<4x324xbf16>
    %cst_102 = arith.constant dense<0.000000e+00> : vector<4x324xf32>
    %249 = tpu.matmul %245, %248, %cst_102 {dimension_numbers = #tpu.dot_dimension_numbers<[1], [0], [0], [1], [0, 0, 1, 1], [], []>} : vector<4x4xbf16>, vector<4x324xbf16>, vector<4x324xf32> -> vector<4x324xf32>
    %250 = arith.addf %243, %249 : vector<4x324xf32>
    %c0_103 = arith.constant 0 : index
    %c0_104 = arith.constant 0 : index
    %251 = vector.load %arg6[%c0_103, %c0_104] : memref<4x1xf32, #tpu.memory_space<vmem>>, vector<4x1xf32>
    %252 = vector.broadcast %251 : vector<4x1xf32> to vector<4x324xf32>
    %253 = arith.mulf %250, %252 : vector<4x324xf32>
    %c0_105 = arith.constant 0 : index
    %c0_106 = arith.constant 0 : index
    %254 = vector.load %arg7[%c0_105, %c0_106] : memref<4x1xf32, #tpu.memory_space<vmem>>, vector<4x1xf32>
    %255 = vector.broadcast %254 : vector<4x1xf32> to vector<4x324xf32>
    %256 = arith.addf %253, %255 : vector<4x324xf32>
    %cst_107 = arith.constant 0.000000e+00 : f32
    %257 = vector.broadcast %cst_107 : f32 to vector<4x324xf32>
    %258 = arith.maximumf %256, %257 : vector<4x324xf32>
    %c0_108 = arith.constant 0 : index
    %c0_109 = arith.constant 0 : index
    %259 = vector.load %arg11[%c0_108, %c0_109] : memref<1x324xf32, #tpu.memory_space<vmem>>, vector<1x324xf32>
    %260 = vector.broadcast %259 : vector<1x324xf32> to vector<4x324xf32>
    %261 = arith.mulf %258, %260 : vector<4x324xf32>
    %262 = arith.truncf %261 : vector<4x324xf32> to vector<4x324xbf16>
    %cst_110 = arith.constant 0.000000e+00 : f32
    %263 = vector.broadcast %cst_110 : f32 to vector<4x324xf32>
    %c0_111 = arith.constant 0 : index
    %c0_112 = arith.constant 0 : index
    %c0_113 = arith.constant 0 : index
    %264 = vector.load %arg8[%c0_111, %c0_112, %c0_113] : memref<9x4x4xbf16, #tpu.memory_space<vmem>>, vector<1x4x4xbf16>
    %265 = vector.shape_cast %264 : vector<1x4x4xbf16> to vector<4x4xbf16>
    %266 = vector.extract_strided_slice %262 {offsets = [0, 305], sizes = [4, 19], strides = [1, 1]} : vector<4x324xbf16> to vector<4x19xbf16>
    %267 = vector.extract_strided_slice %262 {offsets = [0, 0], sizes = [4, 305], strides = [1, 1]} : vector<4x324xbf16> to vector<4x305xbf16>
    %268 = tpu.concatenate %266, %267 in 1 : vector<4x19xbf16>, vector<4x305xbf16> -> vector<4x324xbf16>
    %cst_114 = arith.constant dense<0.000000e+00> : vector<4x324xf32>
    %269 = tpu.matmul %265, %268, %cst_114 {dimension_numbers = #tpu.dot_dimension_numbers<[1], [0], [0], [1], [0, 0, 1, 1], [], []>} : vector<4x4xbf16>, vector<4x324xbf16>, vector<4x324xf32> -> vector<4x324xf32>
    %270 = arith.addf %263, %269 : vector<4x324xf32>
    %c1_115 = arith.constant 1 : index
    %c0_116 = arith.constant 0 : index
    %c0_117 = arith.constant 0 : index
    %271 = vector.load %arg8[%c1_115, %c0_116, %c0_117] : memref<9x4x4xbf16, #tpu.memory_space<vmem>>, vector<1x4x4xbf16>
    %272 = vector.shape_cast %271 : vector<1x4x4xbf16> to vector<4x4xbf16>
    %273 = vector.extract_strided_slice %262 {offsets = [0, 306], sizes = [4, 18], strides = [1, 1]} : vector<4x324xbf16> to vector<4x18xbf16>
    %274 = vector.extract_strided_slice %262 {offsets = [0, 0], sizes = [4, 306], strides = [1, 1]} : vector<4x324xbf16> to vector<4x306xbf16>
    %275 = tpu.concatenate %273, %274 in 1 : vector<4x18xbf16>, vector<4x306xbf16> -> vector<4x324xbf16>
    %cst_118 = arith.constant dense<0.000000e+00> : vector<4x324xf32>
    %276 = tpu.matmul %272, %275, %cst_118 {dimension_numbers = #tpu.dot_dimension_numbers<[1], [0], [0], [1], [0, 0, 1, 1], [], []>} : vector<4x4xbf16>, vector<4x324xbf16>, vector<4x324xf32> -> vector<4x324xf32>
    %277 = arith.addf %270, %276 : vector<4x324xf32>
    %c2_119 = arith.constant 2 : index
    %c0_120 = arith.constant 0 : index
    %c0_121 = arith.constant 0 : index
    %278 = vector.load %arg8[%c2_119, %c0_120, %c0_121] : memref<9x4x4xbf16, #tpu.memory_space<vmem>>, vector<1x4x4xbf16>
    %279 = vector.shape_cast %278 : vector<1x4x4xbf16> to vector<4x4xbf16>
    %280 = vector.extract_strided_slice %262 {offsets = [0, 307], sizes = [4, 17], strides = [1, 1]} : vector<4x324xbf16> to vector<4x17xbf16>
    %281 = vector.extract_strided_slice %262 {offsets = [0, 0], sizes = [4, 307], strides = [1, 1]} : vector<4x324xbf16> to vector<4x307xbf16>
    %282 = tpu.concatenate %280, %281 in 1 : vector<4x17xbf16>, vector<4x307xbf16> -> vector<4x324xbf16>
    %cst_122 = arith.constant dense<0.000000e+00> : vector<4x324xf32>
    %283 = tpu.matmul %279, %282, %cst_122 {dimension_numbers = #tpu.dot_dimension_numbers<[1], [0], [0], [1], [0, 0, 1, 1], [], []>} : vector<4x4xbf16>, vector<4x324xbf16>, vector<4x324xf32> -> vector<4x324xf32>
    %284 = arith.addf %277, %283 : vector<4x324xf32>
    %c3_123 = arith.constant 3 : index
    %c0_124 = arith.constant 0 : index
    %c0_125 = arith.constant 0 : index
    %285 = vector.load %arg8[%c3_123, %c0_124, %c0_125] : memref<9x4x4xbf16, #tpu.memory_space<vmem>>, vector<1x4x4xbf16>
    %286 = vector.shape_cast %285 : vector<1x4x4xbf16> to vector<4x4xbf16>
    %287 = vector.extract_strided_slice %262 {offsets = [0, 323], sizes = [4, 1], strides = [1, 1]} : vector<4x324xbf16> to vector<4x1xbf16>
    %288 = vector.extract_strided_slice %262 {offsets = [0, 0], sizes = [4, 323], strides = [1, 1]} : vector<4x324xbf16> to vector<4x323xbf16>
    %289 = tpu.concatenate %287, %288 in 1 : vector<4x1xbf16>, vector<4x323xbf16> -> vector<4x324xbf16>
    %cst_126 = arith.constant dense<0.000000e+00> : vector<4x324xf32>
    %290 = tpu.matmul %286, %289, %cst_126 {dimension_numbers = #tpu.dot_dimension_numbers<[1], [0], [0], [1], [0, 0, 1, 1], [], []>} : vector<4x4xbf16>, vector<4x324xbf16>, vector<4x324xf32> -> vector<4x324xf32>
    %291 = arith.addf %284, %290 : vector<4x324xf32>
    %c4_127 = arith.constant 4 : index
    %c0_128 = arith.constant 0 : index
    %c0_129 = arith.constant 0 : index
    %292 = vector.load %arg8[%c4_127, %c0_128, %c0_129] : memref<9x4x4xbf16, #tpu.memory_space<vmem>>, vector<1x4x4xbf16>
    %293 = vector.shape_cast %292 : vector<1x4x4xbf16> to vector<4x4xbf16>
    %cst_130 = arith.constant dense<0.000000e+00> : vector<4x324xf32>
    %294 = tpu.matmul %293, %262, %cst_130 {dimension_numbers = #tpu.dot_dimension_numbers<[1], [0], [0], [1], [0, 0, 1, 1], [], []>} : vector<4x4xbf16>, vector<4x324xbf16>, vector<4x324xf32> -> vector<4x324xf32>
    %295 = arith.addf %291, %294 : vector<4x324xf32>
    %c5_131 = arith.constant 5 : index
    %c0_132 = arith.constant 0 : index
    %c0_133 = arith.constant 0 : index
    %296 = vector.load %arg8[%c5_131, %c0_132, %c0_133] : memref<9x4x4xbf16, #tpu.memory_space<vmem>>, vector<1x4x4xbf16>
    %297 = vector.shape_cast %296 : vector<1x4x4xbf16> to vector<4x4xbf16>
    %298 = vector.extract_strided_slice %262 {offsets = [0, 1], sizes = [4, 323], strides = [1, 1]} : vector<4x324xbf16> to vector<4x323xbf16>
    %299 = vector.extract_strided_slice %262 {offsets = [0, 0], sizes = [4, 1], strides = [1, 1]} : vector<4x324xbf16> to vector<4x1xbf16>
    %300 = tpu.concatenate %298, %299 in 1 : vector<4x323xbf16>, vector<4x1xbf16> -> vector<4x324xbf16>
    %cst_134 = arith.constant dense<0.000000e+00> : vector<4x324xf32>
    %301 = tpu.matmul %297, %300, %cst_134 {dimension_numbers = #tpu.dot_dimension_numbers<[1], [0], [0], [1], [0, 0, 1, 1], [], []>} : vector<4x4xbf16>, vector<4x324xbf16>, vector<4x324xf32> -> vector<4x324xf32>
    %302 = arith.addf %295, %301 : vector<4x324xf32>
    %c6_135 = arith.constant 6 : index
    %c0_136 = arith.constant 0 : index
    %c0_137 = arith.constant 0 : index
    %303 = vector.load %arg8[%c6_135, %c0_136, %c0_137] : memref<9x4x4xbf16, #tpu.memory_space<vmem>>, vector<1x4x4xbf16>
    %304 = vector.shape_cast %303 : vector<1x4x4xbf16> to vector<4x4xbf16>
    %305 = vector.extract_strided_slice %262 {offsets = [0, 17], sizes = [4, 307], strides = [1, 1]} : vector<4x324xbf16> to vector<4x307xbf16>
    %306 = vector.extract_strided_slice %262 {offsets = [0, 0], sizes = [4, 17], strides = [1, 1]} : vector<4x324xbf16> to vector<4x17xbf16>
    %307 = tpu.concatenate %305, %306 in 1 : vector<4x307xbf16>, vector<4x17xbf16> -> vector<4x324xbf16>
    %cst_138 = arith.constant dense<0.000000e+00> : vector<4x324xf32>
    %308 = tpu.matmul %304, %307, %cst_138 {dimension_numbers = #tpu.dot_dimension_numbers<[1], [0], [0], [1], [0, 0, 1, 1], [], []>} : vector<4x4xbf16>, vector<4x324xbf16>, vector<4x324xf32> -> vector<4x324xf32>
    %309 = arith.addf %302, %308 : vector<4x324xf32>
    %c7_139 = arith.constant 7 : index
    %c0_140 = arith.constant 0 : index
    %c0_141 = arith.constant 0 : index
    %310 = vector.load %arg8[%c7_139, %c0_140, %c0_141] : memref<9x4x4xbf16, #tpu.memory_space<vmem>>, vector<1x4x4xbf16>
    %311 = vector.shape_cast %310 : vector<1x4x4xbf16> to vector<4x4xbf16>
    %312 = vector.extract_strided_slice %262 {offsets = [0, 18], sizes = [4, 306], strides = [1, 1]} : vector<4x324xbf16> to vector<4x306xbf16>
    %313 = vector.extract_strided_slice %262 {offsets = [0, 0], sizes = [4, 18], strides = [1, 1]} : vector<4x324xbf16> to vector<4x18xbf16>
    %314 = tpu.concatenate %312, %313 in 1 : vector<4x306xbf16>, vector<4x18xbf16> -> vector<4x324xbf16>
    %cst_142 = arith.constant dense<0.000000e+00> : vector<4x324xf32>
    %315 = tpu.matmul %311, %314, %cst_142 {dimension_numbers = #tpu.dot_dimension_numbers<[1], [0], [0], [1], [0, 0, 1, 1], [], []>} : vector<4x4xbf16>, vector<4x324xbf16>, vector<4x324xf32> -> vector<4x324xf32>
    %316 = arith.addf %309, %315 : vector<4x324xf32>
    %c8_143 = arith.constant 8 : index
    %c0_144 = arith.constant 0 : index
    %c0_145 = arith.constant 0 : index
    %317 = vector.load %arg8[%c8_143, %c0_144, %c0_145] : memref<9x4x4xbf16, #tpu.memory_space<vmem>>, vector<1x4x4xbf16>
    %318 = vector.shape_cast %317 : vector<1x4x4xbf16> to vector<4x4xbf16>
    %319 = vector.extract_strided_slice %262 {offsets = [0, 19], sizes = [4, 305], strides = [1, 1]} : vector<4x324xbf16> to vector<4x305xbf16>
    %320 = vector.extract_strided_slice %262 {offsets = [0, 0], sizes = [4, 19], strides = [1, 1]} : vector<4x324xbf16> to vector<4x19xbf16>
    %321 = tpu.concatenate %319, %320 in 1 : vector<4x305xbf16>, vector<4x19xbf16> -> vector<4x324xbf16>
    %cst_146 = arith.constant dense<0.000000e+00> : vector<4x324xf32>
    %322 = tpu.matmul %318, %321, %cst_146 {dimension_numbers = #tpu.dot_dimension_numbers<[1], [0], [0], [1], [0, 0, 1, 1], [], []>} : vector<4x4xbf16>, vector<4x324xbf16>, vector<4x324xf32> -> vector<4x324xf32>
    %323 = arith.addf %316, %322 : vector<4x324xf32>
    %c0_147 = arith.constant 0 : index
    %c0_148 = arith.constant 0 : index
    %324 = vector.load %arg9[%c0_147, %c0_148] : memref<4x1xf32, #tpu.memory_space<vmem>>, vector<4x1xf32>
    %325 = vector.broadcast %324 : vector<4x1xf32> to vector<4x324xf32>
    %326 = arith.mulf %323, %325 : vector<4x324xf32>
    %c0_149 = arith.constant 0 : index
    %c0_150 = arith.constant 0 : index
    %327 = vector.load %arg10[%c0_149, %c0_150] : memref<4x1xf32, #tpu.memory_space<vmem>>, vector<4x1xf32>
    %328 = vector.broadcast %327 : vector<4x1xf32> to vector<4x324xf32>
    %329 = arith.addf %326, %328 : vector<4x324xf32>
    %cst_151 = arith.constant 0.000000e+00 : f32
    %330 = vector.broadcast %cst_151 : f32 to vector<4x324xf32>
    %331 = arith.maximumf %329, %330 : vector<4x324xf32>
    %c0_152 = arith.constant 0 : index
    %c0_153 = arith.constant 0 : index
    %332 = vector.load %arg11[%c0_152, %c0_153] : memref<1x324xf32, #tpu.memory_space<vmem>>, vector<1x324xf32>
    %333 = vector.broadcast %332 : vector<1x324xf32> to vector<4x324xf32>
    %334 = arith.mulf %331, %333 : vector<4x324xf32>
    %c0_154 = arith.constant 0 : index
    %c0_155 = arith.constant 0 : index
    %c0_156 = arith.constant 0 : index
    %335 = vector.load %arg12[%c0_154, %c0_155, %c0_156] : memref<1x4x324xf32, #tpu.memory_space<vmem>>, vector<1x4x324xf32>
    %336 = vector.shape_cast %335 : vector<1x4x324xf32> to vector<4x324xf32>
    %337 = vector.shape_cast %334 : vector<4x324xf32> to vector<1x4x324xf32>
    tpu.vector_store %arg12[%c0_154, %c0_155, %c0_156], %337 {strides = array<i32>} : memref<1x4x324xf32, #tpu.memory_space<vmem>>, vector<1x4x324xf32>,
    return
  }
  func.func @transform_0(%arg0: i32) -> (i32, i32, i32) {
    %c0_i32 = arith.constant 0 : i32
    %c0_i32_0 = arith.constant 0 : i32
    %c0_i32_1 = arith.constant 0 : i32
    return %arg0, %c0_i32, %c0_i32_0 : i32, i32, i32
  }
  func.func @transform_1(%arg0: i32) -> (i32, i32, i32) {
    %c0_i32 = arith.constant 0 : i32
    %c0_i32_0 = arith.constant 0 : i32
    %c0_i32_1 = arith.constant 0 : i32
    return %arg0, %c0_i32, %c0_i32_0 : i32, i32, i32
  }
  func.func @transform_2(%arg0: i32) -> (i32, i32) {
    %c0_i32 = arith.constant 0 : i32
    %c0_i32_0 = arith.constant 0 : i32
    %c0_i32_1 = arith.constant 0 : i32
    return %c0_i32, %c0_i32_0 : i32, i32
  }
  func.func @transform_3(%arg0: i32) -> (i32, i32, i32) {
    %c0_i32 = arith.constant 0 : i32
    %c0_i32_0 = arith.constant 0 : i32
    %c0_i32_1 = arith.constant 0 : i32
    %c0_i32_2 = arith.constant 0 : i32
    return %c0_i32, %c0_i32_0, %c0_i32_1 : i32, i32, i32
  }
  func.func @transform_4(%arg0: i32) -> (i32, i32, i32) {
    %c0_i32 = arith.constant 0 : i32
    %c0_i32_0 = arith.constant 0 : i32
    %c0_i32_1 = arith.constant 0 : i32
    %c0_i32_2 = arith.constant 0 : i32
    return %c0_i32, %c0_i32_0, %c0_i32_1 : i32, i32, i32
  }
  func.func @transform_5(%arg0: i32) -> (i32, i32) {
    %c0_i32 = arith.constant 0 : i32
    %c0_i32_0 = arith.constant 0 : i32
    %c0_i32_1 = arith.constant 0 : i32
    return %c0_i32, %c0_i32_0 : i32, i32
  }
  func.func @transform_6(%arg0: i32) -> (i32, i32) {
    %c0_i32 = arith.constant 0 : i32
    %c0_i32_0 = arith.constant 0 : i32
    %c0_i32_1 = arith.constant 0 : i32
    return %c0_i32, %c0_i32_0 : i32, i32
  }
  func.func @transform_7(%arg0: i32) -> (i32, i32, i32) {
    %c0_i32 = arith.constant 0 : i32
    %c0_i32_0 = arith.constant 0 : i32
    %c0_i32_1 = arith.constant 0 : i32
    %c0_i32_2 = arith.constant 0 : i32
    return %c0_i32, %c0_i32_0, %c0_i32_1 : i32, i32, i32
  }
  func.func @transform_8(%arg0: i32) -> (i32, i32) {
    %c0_i32 = arith.constant 0 : i32
    %c0_i32_0 = arith.constant 0 : i32
    %c0_i32_1 = arith.constant 0 : i32
    return %c0_i32, %c0_i32_0 : i32, i32
  }
  func.func @transform_9(%arg0: i32) -> (i32, i32) {
    %c0_i32 = arith.constant 0 : i32
    %c0_i32_0 = arith.constant 0 : i32
    %c0_i32_1 = arith.constant 0 : i32
    return %c0_i32, %c0_i32_0 : i32, i32
  }
  func.func @transform_10(%arg0: i32) -> (i32, i32) {
    %c0_i32 = arith.constant 0 : i32
    %c0_i32_0 = arith.constant 0 : i32
    %c0_i32_1 = arith.constant 0 : i32
    return %c0_i32, %c0_i32_0 : i32, i32
  }
  func.func @transform_11(%arg0: i32) -> (i32, i32, i32) {
    %c0_i32 = arith.constant 0 : i32
    %c0_i32_0 = arith.constant 0 : i32
    %c0_i32_1 = arith.constant 0 : i32
    return %arg0, %c0_i32, %c0_i32_0 : i32, i32, i32
  }
}

</mosaic_0001>

<bundles_post_ra>
// kernel: up_forward.1
= control target key start
LH: loop header
LB: loop body
LE: loop exit
PB: predicated region body
PF: predicated region fallthrough
CT: control target
= control target key end

     0   :  { %s4488_s17 = smov 0   ;;  %s5209_s0 = inlined_call_operand.vmem [shape: bf16[2,32,8], index: 0, kind: input, shape index: {}]   ;;  %s5210_s1 = inlined_call_operand.vmem [shape: bf16[2,4,324], index: 1, kind: input, shape index: {}]   ;;  %s5211_s2 = inlined_call_operand.vmem [shape: bf16[8,18], index: 2, kind: input, shape index: {}]   ;;  %s5212_s3 = inlined_call_operand.vmem [shape: bf16[9,4,4], index: 3, kind: input, shape index: {}]   ;;  %s5213_s4 = inlined_call_operand.vmem [shape: bf16[9,4,4], index: 4, kind: input, shape index: {}]   ;;  %s5214_s5 = inlined_call_operand.vmem [shape: f32[4,1], index: 5, kind: input, shape index: {}]   ;;  %s5215_s6 = inlined_call_operand.vmem [shape: f32[4,1], index: 6, kind: input, shape index: {}]   ;;  %s5216_s7 = inlined_call_operand.vmem [shape: bf16[9,4,4], index: 7, kind: input, shape index: {}]   ;;  %s5217_s8 = inlined_call_operand.vmem [shape: f32[4,1], index: 8, kind: input, shape index: {}]   ;;  %s5218_s9 = inlined_call_operand.vmem [shape: f32[4,1], index: 9, kind: input, shape index: {}]   ;;  %s5219_s10 = inlined_call_operand.vmem [shape: f32[1,324], index: 10, kind: input, shape index: {}]   ;;  %s5220_s11 = inlined_call_operand.vmem [shape: f32[2,4,324], index: 11, kind: output, shape index: {}]  }
   0x1 LB: > { %s3788_s18 = sadd.s32 4294967295, %s4391_s17   ;;  %p3792_p0 = scmp.ge.s32.totalorder %s4391_s17, 1  ;;  %s4391_s17 = sphi %s4488_s17, %s21_s17  }
   0x2   : > { %p347_p1 = scmp.lt.s32.totalorder %s4391_s17, 3 }
   0x4   : > { %p348_p2 = pnand %p3792_p0, %p347_p1 }
   0x5   : > { %v412_v0 = vld [vmem:[%s5211_s2] sm:$0xf] (!%p348_p2)  ;;  %vm430_vm0 = vcmask (!%p348_p2), 1043456   ;;  %p392_p3 = scmp.lt.s32.totalorder (!%p348_p2), %s3788_s18, 1  ;;  %vm423_vm1 = vcmask (!%p348_p2), 64512   ;;  %s4393_s25 = smov (!%p348_p2), 18  }
   0x6   : > { %351 = sbr.rel (%p348_p2) target bundleno = 1378 (0x562), region = 64  ;;  %4334 = vmatprep.subr.msk.bf16.mxu0 (!%p348_p2), %vm430_vm0, %v412_v0  ;;  %v432_v1 = vsel (!%p348_p2), %vm430_vm0, %v412_v0, 0  ;;  %s4394_s26 = smov (!%p348_p2), 52   ;;  %vm634_vm2 = vcmask (!%p348_p2), 146432   ;;  %vm656_vm3 = vcmask (!%p348_p2), 130048   ;;  %vm659_vm4 = vcmask (!%p348_p2), 277504  }
   0x7   : > { %3967 = vmatpush3.bf16.msra.mxu0 (!%p348_p2), %v432_v1  ;;  %s4395_s27 = smov (!%p348_p2), 36   ;;  %s4396_s28 = smov (!%p348_p2), 70   ;;  %vm638_vm5 = vcmask (!%p348_p2), 293888   ;;  %vm641_vm6 = vcmask (!%p348_p2), 441344   ;;  %vm662_vm7 = vcmask (!%p348_p2), 424960   ;;  %vm644_vm8 = vcmask (!%p348_p2), 588800  }
   0x8   : > { %s4397_s29 = smov (!%p348_p2), 54   ;;  %s4398_s30 = smov (!%p348_p2), 126   ;;  %vm647_vm9 = vcmask (!%p348_p2), 736256   ;;  %vm665_vm10 = vcmask (!%p348_p2), 572416   ;;  %vm650_vm11 = vcmask (!%p348_p2), 883712   ;;  %vm653_vm12 = vcmask (!%p348_p2), 1031168  }
   0x9   : > { %s4399_s12 = smov (!%p348_p2), 124   ;;  %s4400_s13 = smov (!%p348_p2), 34   ;;  %vm668_vm13 = vcmask (!%p348_p2), 719872   ;;  %vm677_vm14 = vcmask (!%p348_p2), 113664   ;;  %vm686_vm15 = vcmask (!%p348_p2), 261120   ;;  %vm671_vm0 = vcmask (!%p348_p2), 867328  }
   0xa   : > { %s4401_s14 = smov (!%p348_p2), 16   ;;  %s4402_s15 = smov (!%p348_p2), 88  }
   0xb   : > { %s4403_s16 = smov (!%p348_p2), 108   ;;  %s4404_s19 = smov (!%p348_p2), 106  }
   0xc   : > { %s4405_s20 = smov (!%p348_p2), 72   ;;  %s4407_s22 = smov (!%p348_p2), 90  }
   0xd   : > { %s5234_s18 = smov (!%p392_p3, %s3788_s18), 1  ;;  %s4408_s23 = smov 32  }
   0xe   : > { %s3908_s21 = sshll.u32 %s5234_s18, 4 }
   0xf   : > { %s396_s24 = scalar_lea.vmem %s5209_s0, %s3908_s21  ;;  %s4406_s21 = smov 14  }
  0x10   : > { %v4382_v2 = vld [vmem:[%s396_s24] sm:$0xff]   ;;  %v4384_v3 = vld [vmem:[%s396_s24 + $0x8] sm:$0xff]   ;;  %s4335_s24 = smul.u32 6, %s5234_s18 }
  0x11   : > { %3968 = vmatprep.mubr.msk.bf16.mxu0 %vm423_vm1, %v4382_v2 }
  0x12   : > { %3969 = vmatmul.mubr.msk.bf16.vlgmr.msra.gmra.mrb[0].mxu0 %vm423_vm1, %v4384_v3  ;;  %vm4412_vm1 = vmmov 0  }
  0xe5   : > { %v3970_v4 = vpop.f32.mrb[0].mxu0 }
  0xe6   : > { %v4505_v5 = vpop.f32.mrb[1].mxu0  ;;  %v540_v6 = vmul.f32 0.8, %v3970_v4  ;;  %v541_v7 = vmul.f32 0.2, %v3970_v4 }
  0xe7   : > { %v4507_v8 = vpop.f32.mrb[2].mxu0  ;;  %v483_v9 = vpack.c.bf16 %v4505_v5, %v4505_v5  ;;  %v484_v10 = vmul.f32 0.53333336, %v4505_v5  ;;  %v485_v11 = vmul.f32 0.46666667, %v4505_v5 }
  0xe8   : > { %v4513_v12 = vpop.f32.mrb[3].mxu0  ;;  %v543_v13 = vrot.slane %v541_v7, 4  ;;  %v547_v14 = vmul.f32 0.33333334, %v3970_v4  ;;  %v548_v15 = vmul.f32 0.6666667, %v3970_v4 }
  0xe9   : > { %584 = vrot.lane.b32.xlu0 %v483_v9, %s4393_s25  ;;  %v487_v16 = vrot.slane %v485_v11, 4  ;;  %v491_v17 = vmul.f32 0.06666667, %v4505_v5  ;;  %v492_v18 = vmul.f32 0.93333334, %v4505_v5 }
  0xea   : > { %v545_v19 = vadd.f32 %v543_v13, %v540_v6  ;;  %v550_v20 = vrot.slane %v548_v15, 4  ;;  %v519_v21 = vmul.f32 0.2, %v4513_v12  ;;  %v520_v22 = vmul.f32 0.8, %v4513_v12 }
  0xeb   : > { %v489_v23 = vadd.f32 %v487_v16, %v484_v10  ;;  %v494_v24 = vrot.slane %v492_v18, 4  ;;  %v568_v25 = vmul.f32 0.93333334, %v4507_v8  ;;  %v569_v26 = vmul.f32 0.06666667, %v4507_v8 }
  0xec   : > { %v546_v27 = vpack.c.bf16 %v545_v19, %v545_v19  ;;  %v552_v28 = vadd.f32 %v550_v20, %v547_v14  ;;  %v522_v29 = vrot.slane %v520_v22, 4  ;;  %v533_v30 = vmul.f32 0.26666668, %v4513_v12 }
  0xed   : > { %v490_v31 = vpack.c.bf16 %v489_v23, %v489_v23  ;;  %v496_v32 = vadd.f32 %v494_v24, %v491_v17  ;;  %v571_v33 = vrot.slane %v569_v26, 4  ;;  %v534_v34 = vmul.f32 0.73333335, %v3970_v4 }
  0xee   : > { %615 = vrot.lane.b32.xlu0 %v546_v27, %s4394_s26  ;;  %v526_v35 = vmul.f32 0.73333335, %v4513_v12  ;;  %v527_v36 = vmul.f32 0.26666668, %v3970_v4  ;;  %v524_v37 = vadd.f32 %v522_v29, %v519_v21  ;;  %v553_v40 = vpack.c.bf16 %v552_v28, %v552_v28  ;;  %s5223_s26 = smov 109  }
  0xef   : > { %587 = vrot.lane.b32.xlu1 %v490_v31, %s4395_s27  ;;  %v573_v38 = vadd.f32 %v571_v33, %v568_v25  ;;  %v536_v39 = vrot.slane %v534_v34, 4  ;;  %v555_v42 = vmul.f32 0.13333334, %v4507_v8  ;;  %v497_v43 = vpack.c.bf16 %v496_v32, %v496_v32  ;;  %s5222_s27 = smov 49  }
  0xf0   : > { %v529_v41 = vrot.slane %v527_v36, 4  ;;  %v513_v45 = vmul.f32 0.33333334, %v4513_v12  ;;  %v554_v47 = vmul.f32 0.8666667, %v3970_v4  ;;  %v525_v50 = vpack.c.bf16 %v524_v37, %v524_v37 }
  0xf1   : > { %v538_v44 = vadd.f32 %v536_v39, %v533_v30  ;;  %v557_v48 = vrot.slane %v555_v42, 4  ;;  %v562_v49 = vmul.f32 0.6, %v4507_v8  ;;  %v574_v51 = vpack.c.bf16 %v573_v38, %v573_v38 }
  0xf2   : > { %618 = vrot.lane.b32.xlu0 %v553_v40, %s4396_s28  ;;  %v531_v46 = vadd.f32 %v529_v41, %v526_v35  ;;  %v499_v52 = vmul.f32 0.4, %v4513_v12  ;;  %v561_v55 = vmul.f32 0.4, %v3970_v4  ;;  %v515_v58 = vrot.slane %v513_v45, 4  ;;  %s401_s28 = scalar_lea.vmem %s5210_s1, %s4335_s24  ;;  %s5221_s24 = smov 50  }
  0xf3   : > { %590 = vrot.lane.b32.xlu1 %v497_v43, %s4397_s29  ;;  %v539_v53 = vpack.c.bf16 %v538_v44, %v538_v44  ;;  %v559_v54 = vadd.f32 %v557_v48, %v554_v47  ;;  %v564_v56 = vrot.slane %v562_v49, 4  ;;  %v498_v59 = vmul.f32 0.6, %v4505_v5  ;;  %s4413_s29 = smov 19  }
  0xf4   : > { %v532_v57 = vpack.c.bf16 %v531_v46, %v531_v46  ;;  %v501_v60 = vrot.slane %v499_v52, 4  ;;  %v512_v62 = vmul.f32 0.6666667, %v4513_v12  ;;  %v506_v0 = vmul.f32 0.8666667, %v4513_v12 }
  0xf5   : > { %v566_v61 = vadd.f32 %v564_v56, %v561_v55  ;;  %v611_v1 = vrot.slane %v539_v53, 2  ;;  %v560_v2 = vpack.c.bf16 %v559_v54, %v559_v54  ;;  %v576_v3 = vmul.f32 0.53333336, %v4507_v8  ;;  %v689_v55 = vld [vmem:[%s401_s28] sm:$0x3f] }
  0xf6   : > { %604 = vrot.lane.b32.xlu0 %v525_v50, %s4398_s30  ;;  %v503_v63 = vadd.f32 %v501_v60, %v498_v59  ;;  %v607_v4 = vrot.slane %v532_v57, 2  ;;  %v517_v6 = vadd.f32 %v515_v58, %v512_v62  ;;  %v505_v7 = vmul.f32 0.13333334, %v4505_v5  ;;  %s4414_s30 = smov 79  }
  0xf7   : > { %629 = vrot.lane.b32.xlu1 %v574_v51, %s4399_s12  ;;  %v508_v9 = vrot.slane %v506_v0, 4  ;;  %v621_v11 = vrot.slane %v560_v2, 2  ;;  %v567_v13 = vpack.c.bf16 %v566_v61, %v566_v61  ;;  %v578_v14 = vrot.slane %v576_v3, 4  ;;  %s4415_s12 = smov 78  }
  0xf8   : > { %v518_v15 = vpack.c.bf16 %v517_v6, %v517_v6  ;;  %v504_v16 = vpack.c.bf16 %v503_v63, %v503_v63  ;;  %v575_v12 = vmul.f32 0.46666667, %v4507_v8  ;;  %v582_v20 = vpack.c.bf16 %v4507_v8, %v4507_v8 }
  0xf9   : > { %v510_v10 = vadd.f32 %v508_v9, %v505_v7  ;;  %v625_v17 = vrot.slane %v567_v13, 2  ;;  %v696_v36 = vlaneseq  ;;  %v4409_v38 = vmov 1983009808  }
  0xfa   : > { %612 = vrot.lane.b32.xlu0 %v611_v1, %s4400_s13  ;;  %v580_v18 = vadd.f32 %v578_v14, %v575_v12  ;;  %v593_v5 = vrot.slane %v504_v16, 2  ;;  %v681_v23 = vsel %vm634_vm2, %v582_v20, 0  ;;  %v694_v39 = vunpack.c.l.s4 %v4409_v38  ;;  %s4416_s13 = smov 17  }
  0xfb   : > { %608 = vrot.lane.b32.xlu1 %v607_v4, %s4401_s14  ;;  %v511_v19 = vpack.c.bf16 %v510_v10, %v510_v10  ;;  %v683_v24 = vrot.slane %v681_v23, 2  ;;  %v4410_v46 = vmov 0.0   ;;  %v4545_v48 = vshrl.u32 %v696_v36, 7  ;;  %s4417_s14 = smov 77  }
  0xfc   : > { %v581_v21 = vpack.c.bf16 %v580_v18, %v580_v18  ;;  %3972 = vmatprep.subr.bf16.mxu0 %v4410_v46  ;;  %v695_v47 = vunpack.c.0.s8 %v694_v39  ;;  %v4411_v57 = vmov 0   ;;  %3974 = vmatprep.mubr.msk.bf16.mxu0 %vm4412_vm1, %v4410_v46  ;;  %v692_v63 = vcombine.high %v689_v55, %v689_v55 }
  0xfd   : > { %v597_v22 = vrot.slane %v511_v19, 2  ;;  %785 = vmatprep.mubr.bf16.mxu1 %v4411_v57  ;;  %4380 = vset.pattern.permute.xlu0 %v4411_v57 }
  0xfe   : > { %622 = vrot.lane.b32.xlu0 %v621_v11, %s4402_s15  ;;  %v698_v58 = vsub.s32 %v695_v47, %v4545_v48  ;;  %4381 = vset.pattern.permute.xlu1 %v4411_v57  ;;  %s4418_s15 = smov 1  }
  0xff   : > { %601 = vrot.lane.b32.xlu1 %v518_v15, %s4403_s16  ;;  %s4419_s16 = smov 61  }
 0x100   : > { %v4566_v1 = vrot.slane %v689_v55, %v698_v58  ;;  %v4573_v3 = vrot.slane %v692_v63, %v698_v58 }
 0x102   : > { %626 = vrot.lane.b32.xlu0 %v625_v17, %s4404_s19  ;;  %v4583_v4 = vcombine.high %v4566_v1, %v4566_v1  ;;  %s4420_s19 = smov 127   ;;  %v723_v17 = vld [vmem:[%s5213_s4] sm:$0x3] }
 0x103   : > { %594 = vrot.lane.b32.xlu1 %v593_v5, %s4405_s20  ;;  %s4421_s20 = smov 67  }
 0x106   : > { %632 = vrot.lane.b32.xlu0 %v581_v21, %s4406_s21  ;;  %s4422_s21 = smov 111  }
 0x107   : > { %598 = vrot.lane.b32.xlu1 %v597_v22, %s4407_s22  ;;  %s5227_s22 = smov 51  }
 0x10b   : > { %684 = vrot.lane.b32.xlu1 %v683_v24, %s4408_s23  ;;  %s5225_s23 = smov 110  }
 0x15b   : > { %v585_v25 = vpop.permute.xlu0 %584 }
 0x15c   : > { %v637_v42 = vsel %vm634_vm2, 0, %v585_v25 }
 0x160   : > { %v616_v26 = vpop.permute.xlu0 %615 }
 0x161   : > { %v588_v27 = vpop.permute.xlu1 %587 }
 0x162   : > { %v640_v43 = vsel %vm638_vm5, %v637_v42, %v588_v27  ;;  %vm744_vm5 = vcmask 1041408  }
 0x164   : > { %v619_v28 = vpop.permute.xlu0 %618 }
 0x165   : > { %v591_v8 = vpop.permute.xlu1 %590 }
 0x166   : > { %v643_v44 = vsel %vm641_vm6, %v640_v43, %v591_v8  ;;  %vm740_vm6 = vcmask 31744   ;;  %v690_v8 = vld [vmem:[%s5212_s3] sm:$0x3] }
 0x168   : > { %v605_v29 = vpop.permute.xlu0 %604 }
 0x169   : > { %v4537_v30 = vpop.permute.xlu1 %629 }
 0x16c   : > { %v613_v31 = vpop.permute.xlu0 %612 }
 0x16d   : > { %v609_v32 = vpop.permute.xlu1 %608 }
 0x16e   : > { %v658_v35 = vsel %vm656_vm3, %v605_v29, %v609_v32  ;;  %vm674_vm3 = vcmask 1014784  }
 0x16f   : > { %v661_v40 = vsel %vm659_vm4, %v658_v35, %v613_v31  ;;  %vm716_vm4 = vcmask 154624  }
 0x170   : > { %v623_v33 = vpop.permute.xlu0 %622  ;;  %v664_v45 = vsel %vm662_vm7, %v661_v40, %v616_v26  ;;  %v3807_v40 = vld [vmem:[%s5212_s3 + $0x2] sm:$0x3]  ;;  %vm1157_vm7 = vcmask 138240  }
 0x171   : > { %v602_v34 = vpop.permute.xlu1 %601  ;;  %v667_v53 = vsel %vm665_vm10, %v664_v45, %v619_v28  ;;  %vm1797_vm10 = vcmask 547840  }
 0x172   : > { %v670_v61 = vsel %vm668_vm13, %v667_v53, %v623_v33  ;;  %vm2236_vm13 = vcmask 900096  }
 0x174   : > { %v627_v37 = vpop.permute.xlu0 %626 }
 0x175   : > { %v595_v41 = vpop.permute.xlu1 %594  ;;  %v673_v0 = vsel %vm671_vm0, %v670_v61, %v627_v37  ;;  %vm2463_vm0 = vcmask 400384  }
 0x176   : > { %v646_v49 = vsel %vm644_vm8, %v643_v44, %v595_v41  ;;  %v4571_v2 = vsel %vm674_vm3, %v673_v0, %v4537_v30  ;;  %vm1379_vm8 = vcmask 7168  }
 0x178   : > { %v633_v51 = vpop.permute.xlu0 %632 }
 0x179   : > { %v599_v50 = vpop.permute.xlu1 %598  ;;  %v679_v59 = vsel %vm677_vm14, %v4537_v30, %v633_v51  ;;  %vm2241_vm14 = vcmask 408576  }
 0x17a   : > { %v649_v52 = vsel %vm647_vm9, %v646_v49, %v599_v50  ;;  %vm1792_vm9 = vcmask 1039360  }
 0x17b   : > { %v652_v54 = vsel %vm650_vm11, %v649_v52, %v602_v34  ;;  %vm2014_vm11 = vcmask 908288  }
 0x17c   : > { %v4548_v56 = vsel %vm653_vm12, %v652_v54, %v605_v29  ;;  %v3811_v54 = vld [vmem:[%s5213_s4 + $0x2] sm:$0x3]  ;;  %vm2019_vm12 = vcmask 416768  }
 0x17d   : > { %729 = vrot.lane.b32.xlu1 %v4548_v56, %s4413_s29  ;;  %v685_v60 = vpop.permute.xlu1 %684 }
 0x17e   : > { %v4560_v62 = vsel %vm686_vm15, %v679_v59, %v685_v60  ;;  %vm2458_vm15 = vcmask 891904  }
 0x17f   : > { %725 = vrot.lane.b32.xlu0 %v4560_v62, %s4414_s30 }
 0x181   : > { %733 = vrot.lane.b32.xlu1 %v4560_v62, %s4413_s29 }
 0x183   : > { %731 = vrot.lane.b32.xlu0 %v4571_v2, %s4413_s29 }
 0x185   : > { %710 = vrot.lane.b32.xlu1 %v4566_v1, %s4413_s29 }
 0x187   : > { %707 = vrot.lane.b32.xlu0 %v4573_v3, %s4414_s30 }
 0x189   : > { %714 = vrot.lane.b32.xlu1 %v4573_v3, %s4413_s29 }
 0x18b   : > { %712 = vrot.lane.b32.xlu0 %v4583_v4, %s4413_s29 }
 0x18d   : > { %930 = vrot.lane.b32.xlu1 %v4566_v1, %s4393_s25 }
 0x18f   : > { %928 = vrot.lane.b32.xlu0 %v4573_v3, %s4415_s12 }
 0x191   : > { %934 = vrot.lane.b32.xlu1 %v4573_v3, %s4393_s25 }
 0x193   : > { %932 = vrot.lane.b32.xlu0 %v4583_v4, %s4393_s25 }
 0x195   : > { %1041 = vrot.lane.b32.xlu1 %v4548_v56, %s4393_s25 }
 0x197   : > { %1039 = vrot.lane.b32.xlu0 %v4560_v62, %s4415_s12 }
 0x199   : > { %1045 = vrot.lane.b32.xlu1 %v4560_v62, %s4393_s25 }
 0x19b   : > { %1043 = vrot.lane.b32.xlu0 %v4571_v2, %s4393_s25 }
 0x19d   : > { %1151 = vrot.lane.b32.xlu1 %v4566_v1, %s4416_s13 }
 0x19f   : > { %1149 = vrot.lane.b32.xlu0 %v4573_v3, %s4417_s14 }
 0x1a1   : > { %1155 = vrot.lane.b32.xlu1 %v4573_v3, %s4416_s13 }
 0x1a3   : > { %1153 = vrot.lane.b32.xlu0 %v4583_v4, %s4416_s13 }
 0x1a5   : > { %1263 = vrot.lane.b32.xlu1 %v4548_v56, %s4416_s13 }
 0x1a7   : > { %1261 = vrot.lane.b32.xlu0 %v4560_v62, %s4417_s14 }
 0x1a9   : > { %1267 = vrot.lane.b32.xlu1 %v4560_v62, %s4416_s13 }
 0x1ab   : > { %1265 = vrot.lane.b32.xlu0 %v4571_v2, %s4416_s13 }
 0x1ad   : > { %1373 = vrot.lane.b32.xlu1 %v4566_v1, %s4418_s15 }
 0x1af   : > { %1371 = vrot.lane.b32.xlu0 %v4573_v3, %s4419_s16 }
 0x1b1   : > { %1377 = vrot.lane.b32.xlu1 %v4573_v3, %s4418_s15 }
 0x1b3   : > { %1375 = vrot.lane.b32.xlu0 %v4583_v4, %s4418_s15 }
 0x1b5   : > { %1485 = vrot.lane.b32.xlu1 %v4548_v56, %s4418_s15 }
 0x1b7   : > { %1483 = vrot.lane.b32.xlu0 %v4560_v62, %s4419_s16 }
 0x1b9   : > { %1489 = vrot.lane.b32.xlu1 %v4560_v62, %s4418_s15 }
 0x1bb   : > { %1487 = vrot.lane.b32.xlu0 %v4571_v2, %s4418_s15 }
 0x1bd   : > { %1788 = vrot.lane.b32.xlu1 %v4583_v4, %s4420_s19 }
 0x1bf   : > { %1786 = vrot.lane.b32.xlu0 %v4566_v1, %s4420_s19 }
 0x1c1   : > { %1795 = vrot.lane.b32.xlu1 %v4566_v1, %s4421_s20 }
 0x1c3   : > { %1790 = vrot.lane.b32.xlu0 %v4573_v3, %s4420_s19 }
 0x1c5   : > { %1900 = vrot.lane.b32.xlu1 %v4571_v2, %s4420_s19 }
 0x1c7   : > { %1898 = vrot.lane.b32.xlu0 %v4548_v56, %s4420_s19 }
 0x1c9   : > { %1906 = vrot.lane.b32.xlu1 %v4548_v56, %s4421_s20 }
 0x1cb   : > { %1902 = vrot.lane.b32.xlu0 %v4560_v62, %s4420_s19 }
 0x1cd   : > { %2010 = vrot.lane.b32.xlu1 %v4583_v4, %s4422_s21 }
 0x1cf   : > { %2008 = vrot.lane.b32.xlu0 %v4566_v1, %s4422_s21 }
 0x1d1   : > { %2017 = vrot.lane.b32.xlu1 %v4566_v1, %s5227_s22 }
 0x1d3   : > { %2012 = vrot.lane.b32.xlu0 %v4573_v3, %s4422_s21 }
 0x1d5   : > { %2122 = vrot.lane.b32.xlu1 %v4571_v2, %s4422_s21 }
 0x1d7   : > { %2120 = vrot.lane.b32.xlu0 %v4548_v56, %s4422_s21 }
 0x1d9   : > { %2128 = vrot.lane.b32.xlu1 %v4548_v56, %s5227_s22 }
 0x1db   : > { %2124 = vrot.lane.b32.xlu0 %v4560_v62, %s4422_s21 }
 0x1dd   : > { %2232 = vrot.lane.b32.xlu1 %v4583_v4, %s5225_s23 }
 0x1df   : > { %2230 = vrot.lane.b32.xlu0 %v4566_v1, %s5225_s23 }
 0x1e1   : > { %2239 = vrot.lane.b32.xlu1 %v4566_v1, %s5221_s24 }
 0x1e3   : > { %2234 = vrot.lane.b32.xlu0 %v4573_v3, %s5225_s23 }
 0x1e5   : > { %2344 = vrot.lane.b32.xlu1 %v4571_v2, %s5225_s23 }
 0x1e7   : > { %2342 = vrot.lane.b32.xlu0 %v4548_v56, %s5225_s23 }
 0x1e9   : > { %2350 = vrot.lane.b32.xlu1 %v4548_v56, %s5221_s24 }
 0x1eb   : > { %2346 = vrot.lane.b32.xlu0 %v4560_v62, %s5225_s23 }
 0x1ed   : > { %2454 = vrot.lane.b32.xlu1 %v4583_v4, %s5223_s26 }
 0x1ef   : > { %2452 = vrot.lane.b32.xlu0 %v4566_v1, %s5223_s26  ;;  %v730_v6 = vpop.permute.xlu1 %729 }
 0x1f1   : > { %2461 = vrot.lane.b32.xlu1 %v4566_v1, %s5222_s27  ;;  %v726_v7 = vpop.permute.xlu0 %725 }
 0x1f2   : > { %v739_v10 = vsel %vm716_vm4, %v726_v7, %v730_v6  ;;  %v3815_v7 = vld [vmem:[%s5212_s3 + $0x4] sm:$0x3] }
 0x1f3   : > { %2456 = vrot.lane.b32.xlu0 %v4573_v3, %s5223_s26  ;;  %v734_v9 = vpop.permute.xlu1 %733  ;;  %v745_v12 = vsel %vm744_vm5, %v739_v10, 0 }
 0x1f5   : > { %2566 = vrot.lane.b32.xlu1 %v4571_v2, %s5223_s26  ;;  %v732_v11 = vpop.permute.xlu0 %731 }
 0x1f6   : > { %v736_v13 = vsel %vm716_vm4, %v732_v11, %v734_v9  ;;  %v735_v14 = vsel %vm716_vm4, %v730_v6, %v732_v11 }
 0x1f7   : > { %v751_v15 = vsel %vm744_vm5, %v736_v13, 0  ;;  %2564 = vrot.lane.b32.xlu0 %v4548_v56, %s5223_s26  ;;  %3801 = vmatprep.subr.msk.bf16.mxu1 %vm744_vm5, %v735_v14  ;;  %v711_v16 = vpop.permute.xlu1 %710 }
 0x1f8   : > { %754 = vmatpush1.bf16.msra.mxu1 %v745_v12  ;;  %3973 = vmatpush3.bf16.msra.mxu0 %v751_v15 }
 0x1f9   : > { %2572 = vrot.lane.b32.xlu1 %v4548_v56, %s5222_s27  ;;  %v708_v18 = vpop.permute.xlu0 %707  ;;  %3978 = vmatprep.subr.bf16.mxu0 %v4410_v46 }
 0x1fa   : > { %v722_v5 = vsel %vm716_vm4, %v708_v18, %v711_v16 }
 0x1fb   : > { %2568 = vrot.lane.b32.xlu0 %v4560_v62, %s5223_s26  ;;  %3802 = vmatmul.mubr.msk.bf16.vlgmr.msra.gmra.mrb[0].mxu1 %vm740_vm6, %v723_v17  ;;  %v715_v19 = vpop.permute.xlu1 %714  ;;  %v837_v20 = vsel %vm744_vm5, %v722_v5, 0  ;;  %v3819_v5 = vld [vmem:[%s5213_s4 + $0x4] sm:$0x3] }
 0x1fc   : > { %3975 = vmatmul.mubr.msk.bf16.vlgmr.msra.gmra.mrb[4].mxu0 %vm740_vm6, %v723_v17  ;;  %877 = vmatprep.mubr.bf16.mxu1 %v4411_v57 }
 0x1fd   : > { %v713_v21 = vpop.permute.xlu0 %712  ;;  %3980 = vmatprep.mubr.msk.bf16.mxu0 %vm4412_vm1, %v4410_v46 }
 0x1fe   : > { %v717_v22 = vsel %vm716_vm4, %v711_v16, %v713_v21  ;;  %v718_v23 = vsel %vm716_vm4, %v713_v21, %v715_v19 }
 0x1ff   : > { %v843_v24 = vsel %vm744_vm5, %v718_v23, 0  ;;  %3804 = vmatprep.subr.msk.bf16.mxu1 %vm744_vm5, %v717_v22  ;;  %v931_v25 = vpop.permute.xlu1 %930 }
 0x200   : > { %846 = vmatpush1.bf16.msra.mxu1 %v837_v20  ;;  %3979 = vmatpush3.bf16.msra.mxu0 %v843_v24 }
 0x201   : > { %v929_v26 = vpop.permute.xlu0 %928  ;;  %3984 = vmatprep.subr.bf16.mxu0 %v4410_v46 }
 0x202   : > { %v941_v27 = vsel %vm634_vm2, %v929_v26, %v931_v25  ;;  %v3823_v26 = vld [vmem:[%s5212_s3 + $0x6] sm:$0x3] }
 0x203   : > { %v935_v28 = vpop.permute.xlu1 %934  ;;  %v945_v29 = vsel %vm744_vm5, %v941_v27, 0 }
 0x205   : > { %v933_v30 = vpop.permute.xlu0 %932 }
 0x206   : > { %v937_v31 = vsel %vm634_vm2, %v931_v25, %v933_v30  ;;  %v938_v32 = vsel %vm634_vm2, %v933_v30, %v935_v28  ;;  %v2681_v30 = vld [vmem:[%s5215_s6] sm:$0xf] }
 0x207   : > { %v951_v33 = vsel %vm744_vm5, %v938_v32, 0  ;;  %3805 = vmatmul.mubr.msk.bf16.vlgmr.msra.gmra.mrb[0].mxu1 %vm740_vm6, %v690_v8  ;;  %3808 = vmatprep.subr.msk.bf16.mxu1 %vm744_vm5, %v937_v31  ;;  %v1042_v34 = vpop.permute.xlu1 %1041  ;;  %v3827_v31 = vld [vmem:[%s5213_s4 + $0x6] sm:$0x3]  ;;  %v1597_v32 = vsel %vm744_vm5, %v4566_v1, 0  ;;  %v3831_v1 = vld [vmem:[%s5212_s3 + $0x8] sm:$0x3] }
 0x208   : > { %3981 = vmatmul.mubr.msk.bf16.vlgmr.msra.gmra.mrb[4].mxu0 %vm740_vm6, %v690_v8  ;;  %954 = vmatpush1.bf16.msra.mxu1 %v945_v29  ;;  %v2672_v29 = vld [vmem:[%s5214_s5] sm:$0xf] }
 0x209   : > { %v1040_v35 = vpop.permute.xlu0 %1039  ;;  %3985 = vmatpush3.bf16.msra.mxu0 %v951_v33  ;;  %985 = vmatprep.mubr.bf16.mxu1 %v4411_v57 }
 0x20a   : > { %3986 = vmatprep.mubr.msk.bf16.mxu0 %vm4412_vm1, %v4410_v46  ;;  %3990 = vmatprep.subr.bf16.mxu0 %v4410_v46  ;;  %v1051_v39 = vsel %vm634_vm2, %v1040_v35, %v1042_v34 }
 0x20b   : > { %v1046_v36 = vpop.permute.xlu1 %1045  ;;  %v1055_v44 = vsel %vm744_vm5, %v1051_v39, 0  ;;  %2675 = vperm.xlu0 %4380, %v2672_v29   ;;  %2684 = vperm.xlu1 %4381, %v2681_v30  }
 0x20d   : > { %v1044_v37 = vpop.permute.xlu0 %1043 }
 0x20e   : > { %v1047_v38 = vsel %vm634_vm2, %v1042_v34, %v1044_v37  ;;  %v1048_v41 = vsel %vm634_vm2, %v1044_v37, %v1046_v36  ;;  %v1698_v36 = vsel %vm744_vm5, %v4560_v62, 0  ;;  %v3835_v62 = vld [vmem:[%s5213_s4 + $0x8] sm:$0x3] }
 0x20f   : > { %3812 = vmatprep.subr.msk.bf16.mxu1 %vm744_vm5, %v1047_v38  ;;  %v1152_v42 = vpop.permute.xlu1 %1151  ;;  %v1061_v45 = vsel %vm744_vm5, %v1048_v41, 0 }
 0x211   : > { %v1150_v43 = vpop.permute.xlu0 %1149 }
 0x212   : > { %v1163_v52 = vsel %vm1157_vm7, %v1150_v43, %v1152_v42 }
 0x213   : > { %3809 = vmatmul.mubr.msk.bf16.vlgmr.msra.gmra.mrb[0].mxu1 %vm740_vm6, %v3807_v40  ;;  %v1156_v50 = vpop.permute.xlu1 %1155  ;;  %v1167_v55 = vsel %vm744_vm5, %v1163_v52, 0 }
 0x214   : > { %3987 = vmatmul.mubr.msk.bf16.vlgmr.msra.gmra.mrb[4].mxu0 %vm740_vm6, %v3807_v40  ;;  %1064 = vmatpush1.bf16.msra.mxu1 %v1055_v44 }
 0x215   : > { %3991 = vmatpush3.bf16.msra.mxu0 %v1061_v45  ;;  %v1154_v47 = vpop.permute.xlu0 %1153  ;;  %1095 = vmatprep.mubr.bf16.mxu1 %v4411_v57 }
 0x216   : > { %v1158_v49 = vsel %vm1157_vm7, %v1152_v42, %v1154_v47  ;;  %3992 = vmatprep.mubr.msk.bf16.mxu0 %vm4412_vm1, %v4410_v46  ;;  %3996 = vmatprep.subr.bf16.mxu0 %v4410_v46  ;;  %v1159_v53 = vsel %vm1157_vm7, %v1154_v47, %v1156_v50  ;;  %v3839_v50 = vld [vmem:[%s5212_s3 + $0xa] sm:$0x3] }
 0x217   : > { %3816 = vmatprep.subr.msk.bf16.mxu1 %vm744_vm5, %v1158_v49  ;;  %v1264_v58 = vpop.permute.xlu1 %1263  ;;  %v1173_v60 = vsel %vm744_vm5, %v1159_v53, 0 }
 0x219   : > { %v1262_v51 = vpop.permute.xlu0 %1261 }
 0x21a   : > { %v1273_v6 = vsel %vm1157_vm7, %v1262_v51, %v1264_v58 }
 0x21b   : > { %v1268_v0 = vpop.permute.xlu1 %1267  ;;  %v1277_v13 = vsel %vm744_vm5, %v1273_v6, 0 }
 0x21d   : > { %v1266_v59 = vpop.permute.xlu0 %1265 }
 0x21e   : > { %v1269_v61 = vsel %vm1157_vm7, %v1264_v58, %v1266_v59  ;;  %v1270_v9 = vsel %vm1157_vm7, %v1266_v59, %v1268_v0  ;;  %v3843_v0 = vld [vmem:[%s5213_s4 + $0xa] sm:$0x3] }
 0x21f   : > { %3813 = vmatmul.mubr.msk.bf16.vlgmr.msra.gmra.mrb[0].mxu1 %vm740_vm6, %v3811_v54  ;;  %v1374_v11 = vpop.permute.xlu1 %1373  ;;  %v1283_v15 = vsel %vm744_vm5, %v1270_v9, 0 }
 0x220   : > { %3993 = vmatmul.mubr.msk.bf16.vlgmr.msra.gmra.mrb[4].mxu0 %vm740_vm6, %v3811_v54  ;;  %1176 = vmatpush1.bf16.msra.mxu1 %v1167_v55 }
 0x221   : > { %3820 = vmatprep.subr.msk.bf16.mxu1 %vm744_vm5, %v1269_v61  ;;  %3997 = vmatpush3.bf16.msra.mxu0 %v1173_v60  ;;  %v1372_v63 = vpop.permute.xlu0 %1371 }
 0x222   : > { %1207 = vmatprep.mubr.bf16.mxu1 %v4411_v57  ;;  %3998 = vmatprep.mubr.msk.bf16.mxu0 %vm4412_vm1, %v4410_v46  ;;  %v1385_v17 = vsel %vm1379_vm8, %v1372_v63, %v1374_v11 }
 0x223   : > { %4002 = vmatprep.subr.bf16.mxu0 %v4410_v46  ;;  %v1378_v12 = vpop.permute.xlu1 %1377  ;;  %v1389_v19 = vsel %vm744_vm5, %v1385_v17, 0 }
 0x225   : > { %v1376_v10 = vpop.permute.xlu0 %1375 }
 0x226   : > { %v1380_v14 = vsel %vm1379_vm8, %v1374_v11, %v1376_v10  ;;  %v1381_v18 = vsel %vm1379_vm8, %v1376_v10, %v1378_v12 }
 0x227   : > { %v1395_v21 = vsel %vm744_vm5, %v1381_v18, 0  ;;  %v1486_v22 = vpop.permute.xlu1 %1485 }
 0x229   : > { %v1484_v16 = vpop.permute.xlu0 %1483 }
 0x22a   : > { %v1495_v24 = vsel %vm1379_vm8, %v1484_v16, %v1486_v22  ;;  %v3847_v16 = vld [vmem:[%s5212_s3 + $0xc] sm:$0x3] }
 0x22b   : > { %3817 = vmatmul.mubr.msk.bf16.vlgmr.msra.gmra.mrb[0].mxu1 %vm740_vm6, %v3815_v7  ;;  %v1490_v25 = vpop.permute.xlu1 %1489  ;;  %v1499_v28 = vsel %vm744_vm5, %v1495_v24, 0 }
 0x22c   : > { %3999 = vmatmul.mubr.msk.bf16.vlgmr.msra.gmra.mrb[4].mxu0 %vm740_vm6, %v3815_v7  ;;  %1286 = vmatpush1.bf16.msra.mxu1 %v1277_v13 }
 0x22d   : > { %4003 = vmatpush3.bf16.msra.mxu0 %v1283_v15  ;;  %1317 = vmatprep.mubr.bf16.mxu1 %v4411_v57  ;;  %v1488_v20 = vpop.permute.xlu0 %1487 }
 0x22e   : > { %4004 = vmatprep.mubr.msk.bf16.mxu0 %vm4412_vm1, %v4410_v46  ;;  %3824 = vmatprep.subr.msk.bf16.mxu1 %vm744_vm5, %v1380_v14  ;;  %v1491_v23 = vsel %vm1379_vm8, %v1486_v22, %v1488_v20  ;;  %v1492_v27 = vsel %vm1379_vm8, %v1488_v20, %v1490_v25  ;;  %v3851_v25 = vld [vmem:[%s5213_s4 + $0xc] sm:$0x3] }
 0x22f   : > { %4008 = vmatprep.subr.bf16.mxu0 %v4410_v46  ;;  %v1505_v8 = vsel %vm744_vm5, %v1492_v27, 0  ;;  %v1789_v34 = vpop.permute.xlu1 %1788 }
 0x231   : > { %v1787_v33 = vpop.permute.xlu0 %1786 }
 0x233   : > { %v1796_v38 = vpop.permute.xlu1 %1795 }
 0x237   : > { %3821 = vmatmul.mubr.msk.bf16.vlgmr.msra.gmra.mrb[0].mxu1 %vm740_vm6, %v3819_v5  ;;  %v1901_v43 = vpop.permute.xlu1 %1900 }
 0x238   : > { %4005 = vmatmul.mubr.msk.bf16.vlgmr.msra.gmra.mrb[4].mxu0 %vm740_vm6, %v3819_v5  ;;  %1398 = vmatpush1.bf16.msra.mxu1 %v1389_v19 }
 0x239   : > { %3828 = vmatprep.subr.msk.bf16.mxu1 %vm744_vm5, %v1491_v23  ;;  %4009 = vmatpush3.bf16.msra.mxu0 %v1395_v21 }
 0x23a   : > { %1429 = vmatprep.mubr.bf16.mxu1 %v4411_v57  ;;  %4010 = vmatprep.mubr.msk.bf16.mxu0 %vm4412_vm1, %v4410_v46 }
 0x23b   : > { %4014 = vmatprep.subr.bf16.mxu0 %v4410_v46  ;;  %v1907_v47 = vpop.permute.xlu1 %1906 }
 0x23f   : > { %v2011_v53 = vpop.permute.xlu1 %2010 }
 0x243   : > { %3825 = vmatmul.mubr.msk.bf16.vlgmr.msra.gmra.mrb[0].mxu1 %vm740_vm6, %v3823_v26  ;;  %v2018_v60 = vpop.permute.xlu1 %2017 }
 0x244   : > { %4011 = vmatmul.mubr.msk.bf16.vlgmr.msra.gmra.mrb[4].mxu0 %vm740_vm6, %v3823_v26  ;;  %1508 = vmatpush1.bf16.msra.mxu1 %v1499_v28 }
 0x245   : > { %4015 = vmatpush3.bf16.msra.mxu0 %v1505_v8  ;;  %1539 = vmatprep.mubr.bf16.mxu1 %v4411_v57 }
 0x246   : > { %4016 = vmatprep.mubr.msk.bf16.mxu0 %vm4412_vm1, %v4410_v46  ;;  %3832 = vmatprep.subr.msk.bf16.mxu1 %vm744_vm5, %v4583_v4  ;;  %v1603_v4 = vsel %vm744_vm5, %v4573_v3, 0  ;;  %v1791_v3 = vpop.permute.xlu0 %1790 }
 0x247   : > { %4020 = vmatprep.subr.bf16.mxu0 %v4410_v46  ;;  %v1794_v35 = vsel %vm1792_vm9, %v1789_v34, %v1791_v3  ;;  %v1800_v39 = vsel %vm1797_vm10, %v1791_v3, %v1796_v38  ;;  %v2123_v10 = vpop.permute.xlu1 %2122 }
 0x248   : > { %v1810_v42 = vsel %vm744_vm5, %v1800_v39, 0  ;;  %v3859_v39 = vld [vmem:[%s5213_s4 + $0xe] sm:$0x3] }
 0x24a   : > { %v1899_v37 = vpop.permute.xlu0 %1898 }
 0x24b   : > { %v1904_v49 = vsel %vm1792_vm9, %v1899_v37, %v1901_v43  ;;  %v2129_v14 = vpop.permute.xlu1 %2128 }
 0x24c   : > { %v1915_v54 = vsel %vm744_vm5, %v1904_v49, 0 }
 0x24e   : > { %v1903_v41 = vpop.permute.xlu0 %1902 }
 0x24f   : > { %3829 = vmatmul.mubr.msk.bf16.vlgmr.msra.gmra.mrb[0].mxu1 %vm740_vm6, %v3827_v31  ;;  %v1905_v44 = vsel %vm1792_vm9, %v1901_v43, %v1903_v41  ;;  %v1910_v51 = vsel %vm1797_vm10, %v1903_v41, %v1907_v47  ;;  %v2233_v18 = vpop.permute.xlu1 %2232  ;;  %v3863_v47 = vld [vmem:[%s5212_s3 + $0x10] sm:$0x3] }
 0x250   : > { %4017 = vmatmul.mubr.msk.bf16.vlgmr.msra.gmra.mrb[4].mxu0 %vm740_vm6, %v3827_v31  ;;  %1606 = vmatpush1.bf16.msra.mxu1 %v1597_v32  ;;  %v1920_v58 = vsel %vm744_vm5, %v1910_v51, 0 }
 0x251   : > { %3836 = vmatprep.subr.msk.bf16.mxu1 %vm744_vm5, %v4571_v2  ;;  %4021 = vmatpush3.bf16.msra.mxu0 %v1603_v4  ;;  %v1694_v2 = vsel %vm744_vm5, %v4548_v56, 0  ;;  %v1793_v56 = vsel %vm1792_vm9, %v1787_v33, %v1789_v34  ;;  %v3855_v4 = vld [vmem:[%s5212_s3 + $0xe] sm:$0x3] }
 0x252   : > { %1637 = vmatprep.mubr.bf16.mxu1 %v4411_v57  ;;  %4022 = vmatprep.mubr.msk.bf16.mxu0 %vm4412_vm1, %v4410_v46  ;;  %v1805_v40 = vsel %vm744_vm5, %v1793_v56, 0  ;;  %v2009_v45 = vpop.permute.xlu0 %2008 }
 0x253   : > { %4026 = vmatprep.subr.bf16.mxu0 %v4410_v46  ;;  %v2015_v61 = vsel %vm2014_vm11, %v2009_v45, %v2011_v53  ;;  %v2240_v22 = vpop.permute.xlu1 %2239 }
 0x254   : > { %v2027_v6 = vsel %vm744_vm5, %v2015_v61, 0 }
 0x256   : > { %v2013_v52 = vpop.permute.xlu0 %2012 }
 0x257   : > { %v2016_v55 = vsel %vm2014_vm11, %v2011_v53, %v2013_v52  ;;  %v2022_v63 = vsel %vm2019_vm12, %v2013_v52, %v2018_v60  ;;  %v2345_v8 = vpop.permute.xlu1 %2344  ;;  %v3867_v52 = vld [vmem:[%s5213_s4 + $0x10] sm:$0x3] }
 0x258   : > { %v2032_v9 = vsel %vm744_vm5, %v2022_v63, 0 }
 0x25a   : > { %v2121_v59 = vpop.permute.xlu0 %2120 }
 0x25b   : > { %3833 = vmatmul.mubr.msk.bf16.vlgmr.msra.gmra.mrb[0].mxu1 %vm740_vm6, %v3831_v1  ;;  %v2126_v15 = vsel %vm2014_vm11, %v2121_v59, %v2123_v10  ;;  %v2351_v31 = vpop.permute.xlu1 %2350  ;;  %v2705_v59 = vsub.s32 2, %v4545_v48 }
 0x25c   : > { %4023 = vmatmul.mubr.msk.bf16.vlgmr.msra.gmra.mrb[4].mxu0 %vm740_vm6, %v3831_v1  ;;  %1701 = vmatpush1.bf16.msra.mxu1 %v1694_v2  ;;  %v2137_v5 = vsel %vm744_vm5, %v2126_v15, 0 }
 0x25d   : > { %4027 = vmatpush3.bf16.msra.mxu0 %v1698_v36  ;;  %1732 = vmatprep.mubr.bf16.mxu1 %v4411_v57 }
 0x25e   : > { %4028 = vmatprep.mubr.msk.bf16.mxu0 %vm4412_vm1, %v4410_v46  ;;  %3840 = vmatprep.subr.msk.bf16.mxu1 %vm744_vm5, %v1794_v35  ;;  %v2125_v7 = vpop.permute.xlu0 %2124 }
 0x25f   : > { %4032 = vmatprep.subr.bf16.mxu0 %v4410_v46  ;;  %v2127_v11 = vsel %vm2014_vm11, %v2123_v10, %v2125_v7  ;;  %v2132_v12 = vsel %vm2019_vm12, %v2125_v7, %v2129_v14  ;;  %v2455_v3 = vpop.permute.xlu1 %2454 }
 0x260   : > { %v2142_v20 = vsel %vm744_vm5, %v2132_v12, 0 }
 0x262   : > { %v2231_v13 = vpop.permute.xlu0 %2230 }
 0x263   : > { %v2237_v23 = vsel %vm2236_vm13, %v2231_v13, %v2233_v18  ;;  %v2462_v37 = vpop.permute.xlu1 %2461 }
 0x264   : > { %v2249_v26 = vsel %vm744_vm5, %v2237_v23, 0 }
 0x266   : > { %v2235_v17 = vpop.permute.xlu0 %2234 }
 0x267   : > { %3837 = vmatmul.mubr.msk.bf16.vlgmr.msra.gmra.mrb[0].mxu1 %vm740_vm6, %v3835_v62  ;;  %v2238_v19 = vsel %vm2236_vm13, %v2233_v18, %v2235_v17  ;;  %v2244_v24 = vsel %vm2241_vm14, %v2235_v17, %v2240_v22 }
 0x268   : > { %4029 = vmatmul.mubr.msk.bf16.vlgmr.msra.gmra.mrb[4].mxu0 %vm740_vm6, %v3835_v62  ;;  %1813 = vmatpush1.bf16.msra.mxu1 %v1805_v40  ;;  %v2254_v28 = vsel %vm744_vm5, %v2244_v24, 0 }
 0x269   : > { %3844 = vmatprep.subr.msk.bf16.mxu1 %vm744_vm5, %v1905_v44  ;;  %4033 = vmatpush3.bf16.msra.mxu0 %v1810_v42  ;;  %v2567_v42 = vpop.permute.xlu1 %2566 }
 0x26a   : > { %1844 = vmatprep.mubr.bf16.mxu1 %v4411_v57  ;;  %4034 = vmatprep.mubr.msk.bf16.mxu0 %vm4412_vm1, %v4410_v46  ;;  %v2343_v21 = vpop.permute.xlu0 %2342 }
 0x26b   : > { %4038 = vmatprep.subr.bf16.mxu0 %v4410_v46  ;;  %v2348_v32 = vsel %vm2236_vm13, %v2343_v21, %v2345_v8 }
 0x26c   : > { %v2359_v34 = vsel %vm744_vm5, %v2348_v32, 0 }
 0x26d   : > { %v2573_v45 = vpop.permute.xlu1 %2572 }
 0x26e   : > { %v2347_v27 = vpop.permute.xlu0 %2346 }
 0x26f   : > { %v2349_v29 = vsel %vm2236_vm13, %v2345_v8, %v2347_v27  ;;  %v2354_v33 = vsel %vm2241_vm14, %v2347_v27, %v2351_v31  ;;  %v3690_v8 = vld [vmem:[%s5217_s8] sm:$0xf] }
 0x270   : > { %v2364_v2 = vsel %vm744_vm5, %v2354_v33, 0 }
 0x272   : > { %v2453_v30 = vpop.permute.xlu0 %2452 }
 0x273   : > { %3841 = vmatmul.mubr.msk.bf16.vlgmr.msra.gmra.mrb[0].mxu1 %vm740_vm6, %v3839_v50  ;;  %v2459_v38 = vsel %vm2458_vm15, %v2453_v30, %v2455_v3 }
 0x274   : > { %4035 = vmatmul.mubr.msk.bf16.vlgmr.msra.gmra.mrb[4].mxu0 %vm740_vm6, %v3839_v50  ;;  %1923 = vmatpush1.bf16.msra.mxu1 %v1915_v54  ;;  %v2471_v62 = vsel %vm744_vm5, %v2459_v38, 0  ;;  %v2697_v54 = vsub.s32 0, %v4545_v48 }
 0x275   : > { %4039 = vmatpush3.bf16.msra.mxu0 %v1920_v58  ;;  %1954 = vmatprep.mubr.bf16.mxu1 %v4411_v57  ;;  %v2693_v58 = vld [vmem:[%s5219_s10] sm:$0x7] }
 0x276   : > { %4040 = vmatprep.mubr.msk.bf16.mxu0 %vm4412_vm1, %v4410_v46  ;;  %3848 = vmatprep.subr.msk.bf16.mxu1 %vm744_vm5, %v2016_v55  ;;  %v2457_v1 = vpop.permute.xlu0 %2456  ;;  %v4983_v14 = vrot.slane %v2693_v58, %v2697_v54  ;;  %v4985_v12 = vrot.slane %v2693_v58, %v2705_v59 }
 0x277   : > { %4044 = vmatprep.subr.bf16.mxu0 %v4410_v46  ;;  %v2460_v35 = vsel %vm2458_vm15, %v2455_v3, %v2457_v1  ;;  %v2466_v56 = vsel %vm2463_vm0, %v2457_v1, %v2462_v37 }
 0x278   : > { %v2476_v41 = vsel %vm744_vm5, %v2466_v56, 0 }
 0x27a   : > { %v2565_v36 = vpop.permute.xlu0 %2564 }
 0x27b   : > { %v2570_v44 = vsel %vm2458_vm15, %v2565_v36, %v2567_v42 }
 0x27c   : > { %v2581_v50 = vsel %vm744_vm5, %v2570_v44, 0 }
 0x27e   : > { %v2569_v40 = vpop.permute.xlu0 %2568 }
 0x27f   : > { %3845 = vmatmul.mubr.msk.bf16.vlgmr.msra.gmra.mrb[0].mxu1 %vm740_vm6, %v3843_v0  ;;  %v2571_v43 = vsel %vm2458_vm15, %v2567_v42, %v2569_v40  ;;  %v2576_v49 = vsel %vm2463_vm0, %v2569_v40, %v2573_v45  ;;  %v2716_v45 = vld [vmem:[%s5216_s7] sm:$0x3] }
 0x280   : > { %4041 = vmatmul.mubr.msk.bf16.vlgmr.msra.gmra.mrb[4].mxu0 %vm740_vm6, %v3843_v0  ;;  %2035 = vmatpush1.bf16.msra.mxu1 %v2027_v6  ;;  %v2586_v51 = vsel %vm744_vm5, %v2576_v49, 0 }
 0x281   : > { %3852 = vmatprep.subr.msk.bf16.mxu1 %vm744_vm5, %v2127_v11  ;;  %4045 = vmatpush3.bf16.msra.mxu0 %v2032_v9  ;;  %v2701_v11 = vsub.s32 1, %v4545_v48 }
 0x282   : > { %2066 = vmatprep.mubr.bf16.mxu1 %v4411_v57  ;;  %4046 = vmatprep.mubr.msk.bf16.mxu0 %vm4412_vm1, %v4410_v46 }
 0x283   : > { %4050 = vmatprep.subr.bf16.mxu0 %v4410_v46 }
 0x28a   : > { %v2676_v53 = vpop.permute.xlu0 %2675  ;;  %v2685_v60 = vpop.permute.xlu1 %2684 }
 0x28b   : > { %3849 = vmatmul.mubr.msk.bf16.vlgmr.msra.gmra.mrb[0].mxu1 %vm740_vm6, %v3847_v16 }
 0x28c   : > { %4047 = vmatmul.mubr.msk.bf16.vlgmr.msra.gmra.mrb[4].mxu0 %vm740_vm6, %v3847_v16  ;;  %2145 = vmatpush1.bf16.msra.mxu1 %v2137_v5 }
 0x28d   : > { %4051 = vmatpush3.bf16.msra.mxu0 %v2142_v20  ;;  %2176 = vmatprep.mubr.bf16.mxu1 %v4411_v57  ;;  %v4987_v20 = vrot.slane %v2693_v58, %v2701_v11 }
 0x28e   : > { %4052 = vmatprep.mubr.msk.bf16.mxu0 %vm4412_vm1, %v4410_v46  ;;  %3856 = vmatprep.subr.msk.bf16.mxu1 %vm744_vm5, %v2238_v19 }
 0x28f   : > { %4056 = vmatprep.subr.bf16.mxu0 %v4410_v46 }
 0x297   : > { %3853 = vmatmul.mubr.msk.bf16.vlgmr.msra.gmra.mrb[0].mxu1 %vm740_vm6, %v3851_v25 }
 0x298   : > { %4053 = vmatmul.mubr.msk.bf16.vlgmr.msra.gmra.mrb[4].mxu0 %vm740_vm6, %v3851_v25  ;;  %2257 = vmatpush1.bf16.msra.mxu1 %v2249_v26 }
 0x299   : > { %3860 = vmatprep.subr.msk.bf16.mxu1 %vm744_vm5, %v2349_v29  ;;  %4057 = vmatpush3.bf16.msra.mxu0 %v2254_v28  ;;  %v3699_v28 = vld [vmem:[%s5218_s9] sm:$0xf] }
 0x29a   : > { %2288 = vmatprep.mubr.bf16.mxu1 %v4411_v57  ;;  %4058 = vmatprep.mubr.msk.bf16.mxu0 %vm4412_vm1, %v4410_v46 }
 0x29b   : > { %4062 = vmatprep.subr.bf16.mxu0 %v4410_v46 }
 0x2a3   : > { %3857 = vmatmul.mubr.msk.bf16.vlgmr.msra.gmra.mrb[0].mxu1 %vm740_vm6, %v3855_v4 }
 0x2a4   : > { %4059 = vmatmul.mubr.msk.bf16.vlgmr.msra.gmra.mrb[4].mxu0 %vm740_vm6, %v3855_v4  ;;  %2367 = vmatpush1.bf16.msra.mxu1 %v2359_v34 }
 0x2a5   : > { %4063 = vmatpush3.bf16.msra.mxu0 %v2364_v2  ;;  %2398 = vmatprep.mubr.bf16.mxu1 %v4411_v57  ;;  %v3871_v2 = vld [vmem:[%s5216_s7 + $0x2] sm:$0x3] }
 0x2a6   : > { %4064 = vmatprep.mubr.msk.bf16.mxu0 %vm4412_vm1, %v4410_v46  ;;  %3864 = vmatprep.subr.msk.bf16.mxu1 %vm744_vm5, %v2460_v35 }
 0x2a7   : > { %4068 = vmatprep.subr.bf16.mxu0 %v4410_v46 }
 0x2af   : > { %3861 = vmatmul.mubr.msk.bf16.vlgmr.msra.gmra.mrb[0].mxu1 %vm740_vm6, %v3859_v39 }
 0x2b0   : > { %4065 = vmatmul.mubr.msk.bf16.vlgmr.msra.gmra.mrb[4].mxu0 %vm740_vm6, %v3859_v39  ;;  %2479 = vmatpush1.bf16.msra.mxu1 %v2471_v62 }
 0x2b1   : > { %3868 = vmatprep.subr.msk.bf16.mxu1 %vm744_vm5, %v2571_v43  ;;  %4069 = vmatpush3.bf16.msra.mxu0 %v2476_v41 }
 0x2b2   : > { %2510 = vmatprep.mubr.bf16.mxu1 %v4411_v57  ;;  %4070 = vmatprep.mubr.msk.bf16.mxu0 %vm4412_vm1, %v4410_v46 }
 0x2b3   : > { %4074 = vmatprep.subr.bf16.mxu0 %v4410_v46 }
 0x2bb   : > { %3865 = vmatmul.mubr.msk.bf16.vlgmr.msra.gmra.mrb[0].mxu1 %vm740_vm6, %v3863_v47 }
 0x2bc   : > { %4071 = vmatmul.mubr.msk.bf16.vlgmr.msra.gmra.mrb[4].mxu0 %vm740_vm6, %v3863_v47  ;;  %2589 = vmatpush1.bf16.msra.mxu1 %v2581_v50 }
 0x2bd   : > { %4075 = vmatpush3.bf16.msra.mxu0 %v2586_v51  ;;  %2620 = vmatprep.mubr.bf16.mxu1 %v4411_v57 }
 0x2be   : > { %4076 = vmatprep.mubr.msk.bf16.mxu0 %vm4412_vm1, %v4410_v46  ;;  %4080 = vmatprep.subr.bf16.mxu0 %v4410_v46 }
 0x2c7   : > { %3869 = vmatmul.mubr.msk.bf16.vlgmr.msra.gmra.mrb[0].mxu1 %vm740_vm6, %v3867_v52 }
 0x2c8   : > { %4077 = vmatmul.mubr.msk.bf16.vlgmr.msra.gmra.mrb[4].mxu0 %vm740_vm6, %v3867_v52  ;;  %2791 = vmatprep.mubr.bf16.mxu1 %v4411_v57 }
 0x2c9   : > { %4082 = vmatprep.mubr.msk.bf16.mxu0 %vm4412_vm1, %v4410_v46 }
 0x39a   : > { %v2622_v55 = vpop.f32.mrb[0].mxu1 }
 0x39b   : > { %v2678_v61 = vmul.f32 %v2676_v53, %v2622_v55  ;;  %v2663_v63 = vpop.f32.mrb[4].mxu0  ;;  %v2624_v0 = vpop.f32.mrb[1].mxu1 }
 0x39c   : > { %v2680_v6 = vmul.f32 %v2676_v53, %v2663_v63  ;;  %v2679_v7 = vmul.f32 %v2676_v53, %v2624_v0  ;;  %v4078_v9 = vpop.f32.mrb[5].mxu0  ;;  %v2626_v10 = vpop.f32.mrb[2].mxu1  ;;  %v3878_v0 = vld [vmem:[%s5216_s7 + $0x4] sm:$0x3] }
 0x39d   : > { %v2666_v13 = vpop.f32.mrb[6].mxu0  ;;  %v2687_v15 = vadd.f32 %v2685_v60, %v2678_v61  ;;  %v2627_v16 = vpop.f32.mrb[3].mxu1  ;;  %v3882_v10 = vld [vmem:[%s5216_s7 + $0x6] sm:$0x3] }
 0x39e   : > { %v2688_v17 = vadd.f32 %v2685_v60, %v2679_v7  ;;  %v2689_v18 = vadd.f32 %v2685_v60, %v2680_v6  ;;  %v4079_v5 = vpop.f32.mrb[7].mxu0 }
 0x39f   : > { %v2690_v19 = vmax.f32 %v2687_v15, 0.0 }
 0x3a0   : > { %v2691_v21 = vmax.f32 %v2688_v17, 0.0  ;;  %v2692_v22 = vmax.f32 %v2689_v18, 0.0 }
 0x3a1   : > { %v2710_v23 = vmul.f32 %v4983_v14, %v2690_v19 }
 0x3a2   : > { %v2712_v24 = vmul.f32 %v4985_v12, %v2692_v22  ;;  %v2711_v25 = vmul.f32 %v4987_v20, %v2691_v21  ;;  %v3886_v22 = vld [vmem:[%s5216_s7 + $0x8] sm:$0x3] }
 0x3a3   : > { %v4991_v48 = vpack.c.bf16 %v2710_v23, %v2710_v23 }
 0x3a4   : > { %v4994_v26 = vpack.c.bf16 %v2712_v24, %v2712_v24  ;;  %v5000_v27 = vpack.c.bf16 %v2711_v25, %v2711_v25 }
 0x3a5   : > { %2737 = vrot.lane.b32.xlu0 %v4991_v48, %s4393_s25  ;;  %v3158_v15 = vsel %vm744_vm5, %v4991_v48, 0 }
 0x3a6   : > { %2735 = vrot.lane.b32.xlu1 %v4994_v26, %s4415_s12  ;;  %s5231_s12 = smov 109   ;;  %v3164_v16 = vsel %vm744_vm5, %v4994_v26, 0 }
 0x3a9   : > { %2741 = vrot.lane.b32.xlu0 %v4994_v26, %s4393_s25 }
 0x3aa   : > { %2739 = vrot.lane.b32.xlu1 %v5000_v27, %s4393_s25  ;;  %s5228_s25 = smov 51  }
 0x3ad   : > { %2722 = vrot.lane.b32.xlu0 %v4991_v48, %s4413_s29 }
 0x3ae   : > { %2718 = vrot.lane.b32.xlu1 %v4994_v26, %s4414_s30  ;;  %s5230_s30 = smov 50  }
 0x3b1   : > { %2726 = vrot.lane.b32.xlu0 %v4994_v26, %s4413_s29 }
 0x3b2   : > { %2724 = vrot.lane.b32.xlu1 %v5000_v27, %s4413_s29  ;;  %s5229_s29 = smov 110  }
 0x3b5   : > { %2936 = vrot.lane.b32.xlu0 %v4991_v48, %s4416_s13 }
 0x3b6   : > { %2934 = vrot.lane.b32.xlu1 %v4994_v26, %s4417_s14 }
 0x3b9   : > { %2940 = vrot.lane.b32.xlu0 %v4994_v26, %s4416_s13 }
 0x3ba   : > { %2938 = vrot.lane.b32.xlu1 %v5000_v27, %s4416_s13  ;;  %s5232_s13 = smov 49  }
 0x3bd   : > { %3046 = vrot.lane.b32.xlu0 %v4991_v48, %s4418_s15 }
 0x3be   : > { %3044 = vrot.lane.b32.xlu1 %v4994_v26, %s4419_s16 }
 0x3c1   : > { %3050 = vrot.lane.b32.xlu0 %v4994_v26, %s4418_s15 }
 0x3c2   : > { %3048 = vrot.lane.b32.xlu1 %v5000_v27, %s4418_s15 }
 0x3c5   : > { %3254 = vrot.lane.b32.xlu0 %v5000_v27, %s4420_s19 }
 0x3c6   : > { %3252 = vrot.lane.b32.xlu1 %v4991_v48, %s4420_s19 }
 0x3c9   : > { %3260 = vrot.lane.b32.xlu0 %v4991_v48, %s4421_s20 }
 0x3ca   : > { %3256 = vrot.lane.b32.xlu1 %v4994_v26, %s4420_s19 }
 0x3cd   : > { %3364 = vrot.lane.b32.xlu0 %v5000_v27, %s4422_s21 }
 0x3ce   : > { %3362 = vrot.lane.b32.xlu1 %v4991_v48, %s4422_s21 }
 0x3d1   : > { %3370 = vrot.lane.b32.xlu0 %v4991_v48, %s5228_s25 }
 0x3d2   : > { %3366 = vrot.lane.b32.xlu1 %v4994_v26, %s4422_s21  ;;  %s4336_s21 = smul.u32 12, %s5234_s18 }
 0x3d4   : > { %s406_s22 = scalar_lea.vmem %s5220_s11, %s4336_s21 }
 0x3d5   : > { %3474 = vrot.lane.b32.xlu0 %v5000_v27, %s5229_s29 }
 0x3d6   : > { %3472 = vrot.lane.b32.xlu1 %v4991_v48, %s5229_s29 }
 0x3d9   : > { %3480 = vrot.lane.b32.xlu0 %v4991_v48, %s5230_s30 }
 0x3da   : > { %3476 = vrot.lane.b32.xlu1 %v4994_v26, %s5229_s29 }
 0x3dd   : > { %3584 = vrot.lane.b32.xlu0 %v5000_v27, %s5231_s12 }
 0x3de   : > { %3582 = vrot.lane.b32.xlu1 %v4991_v48, %s5231_s12 }
 0x3e1   : > { %3590 = vrot.lane.b32.xlu0 %v4991_v48, %s5232_s13 }
 0x3e2   : > { %3586 = vrot.lane.b32.xlu1 %v4994_v26, %s5231_s12 }
 0x3e5   : > { %3702 = vperm.xlu0 %4380, %v3699_v28  }
 0x3e6   : > { %3693 = vperm.xlu1 %4381, %v3690_v8  }
 0x417   : > { %v2738_v29 = vpop.permute.xlu0 %2737 }
 0x418   : > { %v2736_v30 = vpop.permute.xlu1 %2735 }
 0x419   : > { %v2747_v31 = vsel %vm634_vm2, %v2736_v30, %v2738_v29  ;;  %v3890_v30 = vld [vmem:[%s5216_s7 + $0xa] sm:$0x3] }
 0x41a   : > { %v2751_v3 = vsel %vm744_vm5, %v2747_v31, 0 }
 0x41b   : > { %v2742_v32 = vpop.permute.xlu0 %2741 }
 0x41c   : > { %v2740_v4 = vpop.permute.xlu1 %2739 }
 0x41d   : > { %v2743_v33 = vsel %vm634_vm2, %v2738_v29, %v2740_v4  ;;  %v2744_v1 = vsel %vm634_vm2, %v2740_v4, %v2742_v32  ;;  %vm3719_vm2 = vcmask 551936  }
 0x41e   : > { %v2757_v34 = vsel %vm744_vm5, %v2744_v1, 0  ;;  %3872 = vmatprep.subr.msk.bf16.mxu1 %vm744_vm5, %v2743_v33 }
 0x41f   : > { %2760 = vmatpush1.bf16.msra.mxu1 %v2751_v3  ;;  %4081 = vmatpush3.bf16.msra.mxu0 %v2757_v34  ;;  %v2723_v35 = vpop.permute.xlu0 %2722 }
 0x420   : > { %v2719_v36 = vpop.permute.xlu1 %2718  ;;  %4086 = vmatprep.subr.bf16.mxu0 %v4410_v46 }
 0x421   : > { %v2732_v37 = vsel %vm716_vm4, %v2719_v36, %v2723_v35  ;;  %v3894_v36 = vld [vmem:[%s5216_s7 + $0xc] sm:$0x3] }
 0x422   : > { %3873 = vmatmul.mubr.msk.bf16.vlgmr.msra.gmra.mrb[4].mxu1 %vm740_vm6, %v3871_v2  ;;  %4083 = vmatmul.mubr.msk.bf16.vlgmr.msra.gmra.mrb[8].mxu0 %vm740_vm6, %v3871_v2  ;;  %v2843_v40 = vsel %vm744_vm5, %v2732_v37, 0 }
 0x423   : > { %v2727_v38 = vpop.permute.xlu0 %2726  ;;  %2883 = vmatprep.mubr.bf16.mxu1 %v4411_v57  ;;  %4088 = vmatprep.mubr.msk.bf16.mxu0 %vm4412_vm1, %v4410_v46 }
 0x424   : > { %v2725_v56 = vpop.permute.xlu1 %2724 }
 0x425   : > { %v2728_v39 = vsel %vm716_vm4, %v2723_v35, %v2725_v56  ;;  %v2729_v62 = vsel %vm716_vm4, %v2725_v56, %v2727_v38 }
 0x426   : > { %v2849_v41 = vsel %vm744_vm5, %v2729_v62, 0  ;;  %3875 = vmatprep.subr.msk.bf16.mxu1 %vm744_vm5, %v2728_v39 }
 0x427   : > { %2852 = vmatpush1.bf16.msra.mxu1 %v2843_v40  ;;  %4087 = vmatpush3.bf16.msra.mxu0 %v2849_v41  ;;  %v2937_v42 = vpop.permute.xlu0 %2936 }
 0x428   : > { %v2935_v43 = vpop.permute.xlu1 %2934  ;;  %4092 = vmatprep.subr.bf16.mxu0 %v4410_v46 }
 0x429   : > { %v2946_v47 = vsel %vm1157_vm7, %v2935_v43, %v2937_v42  ;;  %v3898_v43 = vld [vmem:[%s5216_s7 + $0xe] sm:$0x3] }
 0x42a   : > { %v2950_v53 = vsel %vm744_vm5, %v2946_v47, 0  ;;  %v3902_v47 = vld [vmem:[%s5216_s7 + $0x10] sm:$0x3] }
 0x42b   : > { %v2941_v44 = vpop.permute.xlu0 %2940 }
 0x42c   : > { %v2939_v49 = vpop.permute.xlu1 %2938 }
 0x42d   : > { %v2942_v50 = vsel %vm1157_vm7, %v2937_v42, %v2939_v49  ;;  %v2943_v51 = vsel %vm1157_vm7, %v2939_v49, %v2941_v44 }
 0x42e   : > { %v2956_v52 = vsel %vm744_vm5, %v2943_v51, 0  ;;  %3876 = vmatmul.mubr.msk.bf16.vlgmr.msra.gmra.mrb[4].mxu1 %vm740_vm6, %v2716_v45  ;;  %4089 = vmatmul.mubr.msk.bf16.vlgmr.msra.gmra.mrb[8].mxu0 %vm740_vm6, %v2716_v45 }
 0x42f   : > { %3879 = vmatprep.subr.msk.bf16.mxu1 %vm744_vm5, %v2942_v50  ;;  %4093 = vmatpush3.bf16.msra.mxu0 %v2956_v52  ;;  %v3047_v54 = vpop.permute.xlu0 %3046 }
 0x430   : > { %2959 = vmatpush1.bf16.msra.mxu1 %v2950_v53  ;;  %v3045_v55 = vpop.permute.xlu1 %3044  ;;  %2990 = vmatprep.mubr.bf16.mxu1 %v4411_v57 }
 0x431   : > { %4094 = vmatprep.mubr.msk.bf16.mxu0 %vm4412_vm1, %v4410_v46  ;;  %4098 = vmatprep.subr.bf16.mxu0 %v4410_v46  ;;  %v3056_v61 = vsel %vm1379_vm8, %v3045_v55, %v3047_v54 }
 0x432   : > { %v3060_v6 = vsel %vm744_vm5, %v3056_v61, 0 }
 0x433   : > { %v3051_v59 = vpop.permute.xlu0 %3050 }
 0x434   : > { %v3049_v58 = vpop.permute.xlu1 %3048 }
 0x435   : > { %v3052_v60 = vsel %vm1379_vm8, %v3047_v54, %v3049_v58  ;;  %v3053_v63 = vsel %vm1379_vm8, %v3049_v58, %v3051_v59 }
 0x436   : > { %3883 = vmatprep.subr.msk.bf16.mxu1 %vm744_vm5, %v3052_v60  ;;  %v3066_v7 = vsel %vm744_vm5, %v3053_v63, 0 }
 0x437   : > { %v3255_v13 = vpop.permute.xlu0 %3254 }
 0x438   : > { %v3253_v9 = vpop.permute.xlu1 %3252 }
 0x439   : > { %v3258_v19 = vsel %vm1792_vm9, %v3253_v9, %v3255_v13 }
 0x43a   : > { %3880 = vmatmul.mubr.msk.bf16.vlgmr.msra.gmra.mrb[4].mxu1 %vm740_vm6, %v3878_v0  ;;  %4095 = vmatmul.mubr.msk.bf16.vlgmr.msra.gmra.mrb[8].mxu0 %vm740_vm6, %v3878_v0  ;;  %v3269_v24 = vsel %vm744_vm5, %v3258_v19, 0 }
 0x43b   : > { %3069 = vmatpush1.bf16.msra.mxu1 %v3060_v6  ;;  %4099 = vmatpush3.bf16.msra.mxu0 %v3066_v7  ;;  %v3261_v5 = vpop.permute.xlu0 %3260 }
 0x43c   : > { %3887 = vmatprep.subr.msk.bf16.mxu1 %vm744_vm5, %v5000_v27  ;;  %3100 = vmatprep.mubr.bf16.mxu1 %v4411_v57  ;;  %v3257_v11 = vpop.permute.xlu1 %3256 }
 0x43d   : > { %4100 = vmatprep.mubr.msk.bf16.mxu0 %vm4412_vm1, %v4410_v46  ;;  %4104 = vmatprep.subr.bf16.mxu0 %v4410_v46  ;;  %v3259_v17 = vsel %vm1792_vm9, %v3255_v13, %v3257_v11  ;;  %v3264_v21 = vsel %vm1797_vm10, %v3257_v11, %v3261_v5 }
 0x43e   : > { %v3274_v48 = vsel %vm744_vm5, %v3264_v21, 0 }
 0x43f   : > { %v3365_v25 = vpop.permute.xlu0 %3364 }
 0x440   : > { %v3363_v18 = vpop.permute.xlu1 %3362 }
 0x441   : > { %v3368_v8 = vsel %vm2014_vm11, %v3363_v18, %v3365_v25 }
 0x442   : > { %v3379_v32 = vsel %vm744_vm5, %v3368_v8, 0 }
 0x443   : > { %v3371_v28 = vpop.permute.xlu0 %3370 }
 0x444   : > { %v3367_v23 = vpop.permute.xlu1 %3366 }
 0x445   : > { %v3369_v26 = vsel %vm2014_vm11, %v3365_v25, %v3367_v23  ;;  %v3374_v29 = vsel %vm2019_vm12, %v3367_v23, %v3371_v28 }
 0x446   : > { %3884 = vmatmul.mubr.msk.bf16.vlgmr.msra.gmra.mrb[4].mxu1 %vm740_vm6, %v3882_v10  ;;  %4101 = vmatmul.mubr.msk.bf16.vlgmr.msra.gmra.mrb[8].mxu0 %vm740_vm6, %v3882_v10  ;;  %v3384_v4 = vsel %vm744_vm5, %v3374_v29, 0 }
 0x447   : > { %3167 = vmatpush1.bf16.msra.mxu1 %v3158_v15  ;;  %4105 = vmatpush3.bf16.msra.mxu0 %v3164_v16  ;;  %v3475_v33 = vpop.permute.xlu0 %3474 }
 0x448   : > { %3891 = vmatprep.subr.msk.bf16.mxu1 %vm744_vm5, %v3259_v17  ;;  %3198 = vmatprep.mubr.bf16.mxu1 %v4411_v57  ;;  %v3473_v27 = vpop.permute.xlu1 %3472 }
 0x449   : > { %4106 = vmatprep.mubr.msk.bf16.mxu0 %vm4412_vm1, %v4410_v46  ;;  %4110 = vmatprep.subr.bf16.mxu0 %v4410_v46  ;;  %v3478_v35 = vsel %vm2236_vm13, %v3473_v27, %v3475_v33 }
 0x44a   : > { %v3489_v38 = vsel %vm744_vm5, %v3478_v35, 0 }
 0x44b   : > { %v3481_v34 = vpop.permute.xlu0 %3480 }
 0x44c   : > { %v3477_v31 = vpop.permute.xlu1 %3476 }
 0x44d   : > { %v3479_v1 = vsel %vm2236_vm13, %v3475_v33, %v3477_v31  ;;  %v3484_v2 = vsel %vm2241_vm14, %v3477_v31, %v3481_v34 }
 0x44e   : > { %v3494_v56 = vsel %vm744_vm5, %v3484_v2, 0 }
 0x44f   : > { %v3585_v39 = vpop.permute.xlu0 %3584 }
 0x450   : > { %v3583_v3 = vpop.permute.xlu1 %3582 }
 0x451   : > { %v3588_v41 = vsel %vm2458_vm15, %v3583_v3, %v3585_v39 }
 0x452   : > { %3888 = vmatmul.mubr.msk.bf16.vlgmr.msra.gmra.mrb[4].mxu1 %vm740_vm6, %v3886_v22  ;;  %4107 = vmatmul.mubr.msk.bf16.vlgmr.msra.gmra.mrb[8].mxu0 %vm740_vm6, %v3886_v22  ;;  %v3599_v44 = vsel %vm744_vm5, %v3588_v41, 0 }
 0x453   : > { %3277 = vmatpush1.bf16.msra.mxu1 %v3269_v24  ;;  %4111 = vmatpush3.bf16.msra.mxu0 %v3274_v48  ;;  %v3591_v40 = vpop.permute.xlu0 %3590 }
 0x454   : > { %3895 = vmatprep.subr.msk.bf16.mxu1 %vm744_vm5, %v3369_v26  ;;  %3308 = vmatprep.mubr.bf16.mxu1 %v4411_v57  ;;  %v3587_v37 = vpop.permute.xlu1 %3586 }
 0x455   : > { %4112 = vmatprep.mubr.msk.bf16.mxu0 %vm4412_vm1, %v4410_v46  ;;  %4116 = vmatprep.subr.bf16.mxu0 %v4410_v46  ;;  %v3589_v62 = vsel %vm2458_vm15, %v3585_v39, %v3587_v37  ;;  %v3594_v42 = vsel %vm2463_vm0, %v3587_v37, %v3591_v40 }
 0x456   : > { %v3604_v45 = vsel %vm744_vm5, %v3594_v42, 0 }
 0x45e   : > { %3892 = vmatmul.mubr.msk.bf16.vlgmr.msra.gmra.mrb[4].mxu1 %vm740_vm6, %v3890_v30  ;;  %4113 = vmatmul.mubr.msk.bf16.vlgmr.msra.gmra.mrb[8].mxu0 %vm740_vm6, %v3890_v30 }
 0x45f   : > { %3387 = vmatpush1.bf16.msra.mxu1 %v3379_v32  ;;  %4117 = vmatpush3.bf16.msra.mxu0 %v3384_v4 }
 0x460   : > { %3899 = vmatprep.subr.msk.bf16.mxu1 %vm744_vm5, %v3479_v1  ;;  %3418 = vmatprep.mubr.bf16.mxu1 %v4411_v57 }
 0x461   : > { %4118 = vmatprep.mubr.msk.bf16.mxu0 %vm4412_vm1, %v4410_v46  ;;  %4122 = vmatprep.subr.bf16.mxu0 %v4410_v46 }
 0x464   : > { %v3703_v50 = vpop.permute.xlu0 %3702 }
 0x465   : > { %v3694_v49 = vpop.permute.xlu1 %3693 }
 0x46a   : > { %3896 = vmatmul.mubr.msk.bf16.vlgmr.msra.gmra.mrb[4].mxu1 %vm740_vm6, %v3894_v36  ;;  %4119 = vmatmul.mubr.msk.bf16.vlgmr.msra.gmra.mrb[8].mxu0 %vm740_vm6, %v3894_v36 }
 0x46b   : > { %3497 = vmatpush1.bf16.msra.mxu1 %v3489_v38  ;;  %4123 = vmatpush3.bf16.msra.mxu0 %v3494_v56 }
 0x46c   : > { %3903 = vmatprep.subr.msk.bf16.mxu1 %vm744_vm5, %v3589_v62  ;;  %3528 = vmatprep.mubr.bf16.mxu1 %v4411_v57 }
 0x46d   : > { %4124 = vmatprep.mubr.msk.bf16.mxu0 %vm4412_vm1, %v4410_v46  ;;  %4128 = vmatprep.subr.bf16.mxu0 %v4410_v46 }
 0x476   : > { %3900 = vmatmul.mubr.msk.bf16.vlgmr.msra.gmra.mrb[4].mxu1 %vm740_vm6, %v3898_v43  ;;  %4125 = vmatmul.mubr.msk.bf16.vlgmr.msra.gmra.mrb[8].mxu0 %vm740_vm6, %v3898_v43 }
 0x477   : > { %3607 = vmatpush1.bf16.msra.mxu1 %v3599_v44  ;;  %4129 = vmatpush3.bf16.msra.mxu0 %v3604_v45 }
 0x478   : > { %3638 = vmatprep.mubr.bf16.mxu1 %v4411_v57  ;;  %4130 = vmatprep.mubr.msk.bf16.mxu0 %vm4412_vm1, %v4410_v46 }
 0x482   : > { %3904 = vmatmul.mubr.msk.bf16.vlgmr.msra.gmra.mrb[4].mxu1 %vm740_vm6, %v3902_v47  ;;  %4131 = vmatmul.mubr.msk.bf16.vlgmr.msra.gmra.mrb[8].mxu0 %vm740_vm6, %v3902_v47 }
 0x555   : > { %v3640_v51 = vpop.f32.mrb[4].mxu1  ;;  %v3681_v52 = vpop.f32.mrb[8].mxu0 }
 0x556   : > { %v3696_v53 = vmul.f32 %v3694_v49, %v3640_v51  ;;  %v3698_v54 = vmul.f32 %v3694_v49, %v3681_v52  ;;  %v3642_v55 = vpop.f32.mrb[5].mxu1  ;;  %v4132_v58 = vpop.f32.mrb[9].mxu0 }
 0x557   : > { %v3697_v57 = vmul.f32 %v3694_v49, %v3642_v55  ;;  %v3644_v59 = vpop.f32.mrb[6].mxu1  ;;  %v3684_v46 = vpop.f32.mrb[10].mxu0 }
 0x558   : > { %v3705_v60 = vadd.f32 %v3703_v50, %v3696_v53  ;;  %v3707_v61 = vadd.f32 %v3703_v50, %v3698_v54  ;;  %v3645_v63 = vpop.f32.mrb[7].mxu1  ;;  %v4133_v0 = vpop.f32.mrb[11].mxu0 }
 0x559   : > { %v3706_v6 = vadd.f32 %v3703_v50, %v3697_v57 }
 0x55a   : > { %v3708_v7 = vmax.f32 %v3705_v60, 0.0  ;;  %v3710_v9 = vmax.f32 %v3707_v61, 0.0 }
 0x55b   : > { %v3709_v10 = vmax.f32 %v3706_v6, 0.0 }
 0x55c   : > { %v3711_v11 = vmul.f32 %v3708_v7, %v4983_v14  ;;  %v3713_v13 = vmul.f32 %v3710_v9, %v4985_v12 }
 0x55d   : > { %v3712_v15 = vmul.f32 %v3709_v10, %v4987_v20 }
 0x55e   : > { %3720 = vst.msk [vmem:[%s406_s22 + $0x8] sm:$0xf] %vm3719_vm2, %v3713_v13 }
 0x55f   : > { %v3716_v16 = vcombine.low %v3711_v11, %v3712_v15 }
 0x561   : > { %3718 = vst [vmem:[%s406_s22] sm:$0xff] %v3716_v16 }
 0x562 PF: > { %s21_s17 = sadd.s32 1, %s4391_s17  }
 0x563   : > { %p18_p4 = scmp.ge.s32.totalorder %s21_s17, 4  }
 0x565   :  { %20 = sbr.rel (!%p18_p4) target bundleno = 1 (0x1), region = 121 }

</bundles_post_ra>
